<compile_context>
chip_gen: v7x
topology: tpu7x:2x2x1
jax: 0.10.0
libtpu: 0.0.40
codegen_flags: <defaults>
</compile_context>

<pallas_src>
import math
from functools import partial

import jax
import jax.numpy as jnp
from jax.experimental import pallas as pl
from jax.experimental.pallas import tpu as pltpu

MATMUL_DTYPE = jnp.bfloat16


def _round_up(n, m):
    return ((n + m - 1) // m) * m


def _default_vmem_limit():
    # Per-generation scoped-VMEM limit: leave ~16 MiB headroom under physical.
    try:
        cap = pltpu.get_tpu_info().vmem_capacity_bytes
        return int(max(32 * 1024 * 1024,
                       min(cap - 16 * 1024 * 1024, 100 * 1024 * 1024)))
    except Exception:
        return 48 * 1024 * 1024


_VMEM_LIMIT = _default_vmem_limit()


# ----------------------------------------------------------------------------
# In-kernel helpers
# ----------------------------------------------------------------------------
def _layernorm(x, gamma, beta, eps=1e-6):
    # x: (rows, D) f32 ; gamma/beta: (1, D) f32 ; eps matches nn.LayerNorm(eps=1e-6)
    mu = jnp.mean(x, axis=-1, keepdims=True)
    xc = x - mu
    var = jnp.mean(xc * xc, axis=-1, keepdims=True)
    return xc * jax.lax.rsqrt(var + eps) * gamma + beta


def _erf(x):
    # Abramowitz & Stegun 7.1.26 (|err| < 1.5e-7): keeps torch's exact-erf GELU
    # semantics while lowering only to exp/mul/add (compile-safe in Mosaic).
    # TODO(synk): on v5e (weak VALU), consider a tanh-based GELU if the parity
    # tolerance allows moving this work to the EUP.
    a1, a2, a3, a4, a5 = 0.254829592, -0.284496736, 1.421413741, -1.453152027, 1.061405429
    p = 0.3275911
    sgn = jnp.where(x >= 0.0, 1.0, -1.0)
    ax = jnp.abs(x)
    t = 1.0 / (1.0 + p * ax)
    poly = ((((a5 * t + a4) * t + a3) * t + a2) * t + a1) * t
    return sgn * (1.0 - poly * jnp.exp(-ax * ax))


def _gelu(x):
    return 0.5 * x * (1.0 + _erf(x * 0.7071067811865475))


def _mm(a, w, b=None):
    # bf16 operands, f32 accumulation on the MXU.
    out = jnp.dot(a.astype(MATMUL_DTYPE), w, preferred_element_type=jnp.float32)
    if b is not None:
        out = out + b
    return out


# ----------------------------------------------------------------------------
# Pallas kernels
# ----------------------------------------------------------------------------
def patch_embed_kernel(p_ref, w_ref, b_ref, o_ref):
    # p: (tile, K) bf16, w: (K, D) bf16, b: (1, D) f32
    o_ref[...] = _mm(p_ref[...], w_ref[...], b_ref[...]).astype(o_ref.dtype)


def encoder_layer_kernel(x_ref, ln1w_ref, ln1b_ref, wqkv_ref, bqkv_ref,
                         wo_ref, bo_ref, ln2w_ref, ln2b_ref,
                         w1_ref, b1_ref, w2_ref, b2_ref,
                         o_ref, ctx_ref, *, num_heads, seq_valid):
    # One full encoder block per grid step; grid = (batch, layer).
    layer = pl.program_id(1)

    # Layer 0 seeds the residual stream; afterwards the (1, S, D) output block
    # stays resident in VMEM across the "arbitrary" layer axis (zero HBM
    # traffic for activations between layers).
    @pl.when(layer == 0)
    def _():
        o_ref[...] = x_ref[...]

    S, D = o_ref.shape[1], o_ref.shape[2]
    hd = D // num_heads

    x = o_ref[0].astype(jnp.float32)                       # (S, D) residual
    h = _layernorm(x, ln1w_ref[0], ln1b_ref[0])

    # Fused Q/K/V projection: single (S, 3D) MXU pass; 1/sqrt(hd) is folded
    # into the Q columns of wqkv/bqkv at prepare time.
    qkv = _mm(h, wqkv_ref[0], bqkv_ref[0])                 # (S, 3D) f32

    # Mask padded key positions (sequence was padded for lane/sublane alignment).
    if S > seq_valid:
        kidx = jax.lax.broadcasted_iota(jnp.int32, (1, S), 1)
        key_bias = jnp.where(kidx < seq_valid, 0.0, -1e30).astype(jnp.float32)
    else:
        key_bias = None

    # Per-head attention, heads looped (unrolled) inside the kernel; ctx is
    # assembled in a VMEM scratch, no HBM round-trip or lane repacking.
    for hh in range(num_heads):
        q = qkv[:, hh * hd:(hh + 1) * hd].astype(MATMUL_DTYPE)          # pre-scaled
        k = qkv[:, D + hh * hd:D + (hh + 1) * hd].astype(MATMUL_DTYPE)
        v = qkv[:, 2 * D + hh * hd:2 * D + (hh + 1) * hd].astype(MATMUL_DTYPE)
        s = jnp.einsum('qd,kd->qk', q, k, preferred_element_type=jnp.float32)
        if key_bias is not None:
            s = s + key_bias
        m = jnp.max(s, axis=-1, keepdims=True)
        e = jnp.exp(s - m)
        p = (e * pl.reciprocal(jnp.sum(e, axis=-1, keepdims=True), approx=True)
             ).astype(MATMUL_DTYPE)
        ctx_ref[:, hh * hd:(hh + 1) * hd] = jnp.dot(
            p, v, preferred_element_type=jnp.float32).astype(ctx_ref.dtype)

    # Out-proj + residual, LN2, MLP (exact-erf GELU) + residual.
    x2 = x + _mm(ctx_ref[...], wo_ref[0], bo_ref[0])
    h2 = _layernorm(x2, ln2w_ref[0], ln2b_ref[0])
    g = _gelu(_mm(h2, w1_ref[0], b1_ref[0]))
    y = x2 + _mm(g, w2_ref[0], b2_ref[0])
    o_ref[0] = y.astype(o_ref.dtype)


def ln_head_kernel(x_ref, g_ref, be_ref, w_ref, hb_ref, o_ref):
    # x: (B, D) class tokens; final encoder LN fused with the classification head.
    x = x_ref[...].astype(jnp.float32)
    h = _layernorm(x, g_ref[...], be_ref[...])
    o_ref[...] = _mm(h, w_ref[...], hb_ref[...]).astype(o_ref.dtype)  # (B, C_pad)


# ----------------------------------------------------------------------------
# Pallas wrappers
# ----------------------------------------------------------------------------
def patch_embed(patches, w, b, tile_m=512):
    R, K = patches.shape
    D = w.shape[1]
    tile = min(tile_m, _round_up(R, 8))
    Rp = _round_up(R, tile)
    if Rp != R:
        patches = jnp.pad(patches, ((0, Rp - R), (0, 0)))
    out = pl.pallas_call(
        patch_embed_kernel,
        grid=(Rp // tile,),
        in_specs=[pl.BlockSpec((tile, K), lambda i: (i, 0)),
                  pl.BlockSpec((K, D), lambda i: (0, 0)),     # weight resident
                  pl.BlockSpec((1, D), lambda i: (0, 0))],
        out_specs=pl.BlockSpec((tile, D), lambda i: (i, 0)),
        out_shape=jax.ShapeDtypeStruct((Rp, D), jnp.float32),
        compiler_params=pltpu.CompilerParams(
            dimension_semantics=("parallel",), vmem_limit_bytes=_VMEM_LIMIT),
    )(patches, w, b)
    return out[:R]


def _wspec(shape):
    # Stacked per-layer parameter (L, *shape): indexed by the layer grid axis,
    # so BlockSpec pipelining prefetches layer l+1 weights during layer l.
    return pl.BlockSpec((1,) + shape, lambda b, l: (l,) + (0,) * len(shape))


def encoder_stack(seq, sp, *, num_heads, seq_valid):
    B, S_pad, D = seq.shape
    L = sp['wqkv'].shape[0]
    M = sp['w1'].shape[2]
    x_spec = pl.BlockSpec((1, S_pad, D), lambda b, l: (b, 0, 0))
    kernel = partial(encoder_layer_kernel, num_heads=num_heads,
                     seq_valid=seq_valid)
    return pl.pallas_call(
        kernel,
        grid=(B, L),
        in_specs=[x_spec,
                  _wspec((1, D)), _wspec((1, D)),           # ln1 w, b
                  _wspec((D, 3 * D)), _wspec((1, 3 * D)),   # fused qkv w, b
                  _wspec((D, D)), _wspec((1, D)),           # out-proj w, b
                  _wspec((1, D)), _wspec((1, D)),           # ln2 w, b
                  _wspec((D, M)), _wspec((1, M)),           # mlp w1, b1
                  _wspec((M, D)), _wspec((1, D))],          # mlp w2, b2
        out_specs=x_spec,
        out_shape=jax.ShapeDtypeStruct((B, S_pad, D), jnp.float32),
        scratch_shapes=[pltpu.VMEM((S_pad, D), MATMUL_DTYPE)],   # attention ctx
        compiler_params=pltpu.CompilerParams(
            dimension_semantics=("parallel", "arbitrary"),
            vmem_limit_bytes=_VMEM_LIMIT),
    )(seq, sp['ln1_w'], sp['ln1_b'], sp['wqkv'], sp['bqkv'],
      sp['wo'], sp['bo'], sp['ln2_w'], sp['ln2_b'],
      sp['w1'], sp['b1'], sp['w2'], sp['b2'])


def ln_head(cls_tokens, ln_w, ln_b, head_w, head_b, num_classes):
    B, _ = cls_tokens.shape
    Cp = head_w.shape[1]
    vspec = pl.BlockSpec(memory_space=pltpu.MemorySpace.VMEM)
    out = pl.pallas_call(
        ln_head_kernel,
        in_specs=[vspec] * 5,
        out_specs=vspec,
        out_shape=jax.ShapeDtypeStruct((B, Cp), jnp.float32),
        compiler_params=pltpu.CompilerParams(vmem_limit_bytes=_VMEM_LIMIT),
    )(cls_tokens, ln_w, ln_b, head_w, head_b)
    return out[:, :num_classes]


# ----------------------------------------------------------------------------
# Model glue (reshapes / parameter plumbing in plain JAX)
# ----------------------------------------------------------------------------
def extract_patches(x, p):
    # (B, C, H, W) NCHW -> (B*num_patches, C*p*p); pixel order (c, ph, pw)
    # matches conv_w.reshape(D, C*p*p).
    B, C, H, W = x.shape
    nh, nw = H // p, W // p
    x = x.reshape(B, C, nh, p, nw, p)
    x = x.transpose(0, 2, 4, 1, 3, 5)
    return x.reshape(B * nh * nw, C * p * p)


def init_params(key, *, image_size, patch_size, num_layers, num_heads,
                hidden_dim, mlp_dim, num_classes):
    # Parameters in torch layout, float32 (matching the nn.Module definition).
    D, M, P = hidden_dim, mlp_dim, patch_size
    seq_length = (image_size // patch_size) ** 2 + 1
    keys = iter(jax.random.split(key, 4 + 4 * num_layers))
    nrm = lambda shape, std=0.02: (std * jax.random.normal(next(keys), shape)
                                   ).astype(jnp.float32)
    params = {
        'conv_w': nrm((D, 3, P, P), std=math.sqrt(1.0 / (3 * P * P))),
        'conv_b': jnp.zeros((D,), jnp.float32),
        'class_token': jnp.zeros((1, 1, D), jnp.float32),
        'pos_emb': nrm((1, seq_length, D), std=0.02),
        'ln_w': jnp.ones((D,), jnp.float32),
        'ln_b': jnp.zeros((D,), jnp.float32),
        # NOTE: torchvision zero-inits the head; small random init keeps the
        # synthetic output non-trivial (parity-only difference).
        'head_w': nrm((num_classes, D), std=0.02),
        'head_b': jnp.zeros((num_classes,), jnp.float32),
        'layers': [],
    }
    for _ in range(num_layers):
        params['layers'].append({
            'ln1_w': jnp.ones((D,), jnp.float32),
            'ln1_b': jnp.zeros((D,), jnp.float32),
            'wqkv': nrm((3 * D, D)),                      # torch in_proj_weight
            'bqkv': jnp.zeros((3 * D,), jnp.float32),
            'wo': nrm((D, D)),                            # torch out_proj.weight
            'bo': jnp.zeros((D,), jnp.float32),
            'ln2_w': jnp.ones((D,), jnp.float32),
            'ln2_b': jnp.zeros((D,), jnp.float32),
            'w1': nrm((M, D)),                            # torch linear_1.weight
            'b1': jnp.zeros((M,), jnp.float32),
            'w2': nrm((D, M)),                            # torch linear_2.weight
            'b2': jnp.zeros((D,), jnp.float32),
        })
    return params


def prepare_kernel_params(p, *, num_heads):
    # One-time conversion: transpose to (in, out), cast matmul weights to bf16,
    # fuse Wq/Wk/Wv into a single (D, 3D) weight with 1/sqrt(head_dim) folded
    # into the Q columns, stack per-layer params along a leading L axis, and
    # pad classifier lanes to a multiple of 128.
    D = p['conv_w'].shape[0]
    C = p['head_w'].shape[0]
    hd = D // num_heads
    scale = 1.0 / math.sqrt(hd)
    Cpad = _round_up(C, 128)
    row = lambda v: v.reshape(1, -1).astype(jnp.float32)

    kp = {
        'conv_w_t': p['conv_w'].reshape(D, -1).T.astype(MATMUL_DTYPE),   # (K, D)
        'conv_b': row(p['conv_b']),
        'class_token': p['class_token'],
        'pos_emb': p['pos_emb'],
        'ln_w': row(p['ln_w']),
        'ln_b': row(p['ln_b']),
        'head_w': jnp.pad(p['head_w'].T, ((0, 0), (0, Cpad - C))).astype(MATMUL_DTYPE),
        'head_b': row(jnp.pad(p['head_b'], (0, Cpad - C))),
    }

    acc = {k: [] for k in ('ln1_w', 'ln1_b', 'wqkv', 'bqkv', 'wo', 'bo',
                           'ln2_w', 'ln2_b', 'w1', 'b1', 'w2', 'b2')}
    for lp in p['layers']:
        wq, wk, wv = jnp.split(lp['wqkv'], 3, axis=0)     # torch q/k/v row blocks
        bq, bk, bv = jnp.split(lp['bqkv'], 3)
        acc['wqkv'].append(jnp.concatenate([wq.T * scale, wk.T, wv.T], axis=1))
        acc['bqkv'].append(jnp.concatenate([bq * scale, bk, bv]))
        acc['ln1_w'].append(lp['ln1_w']); acc['ln1_b'].append(lp['ln1_b'])
        acc['wo'].append(lp['wo'].T);     acc['bo'].append(lp['bo'])
        acc['ln2_w'].append(lp['ln2_w']); acc['ln2_b'].append(lp['ln2_b'])
        acc['w1'].append(lp['w1'].T);     acc['b1'].append(lp['b1'])
        acc['w2'].append(lp['w2'].T);     acc['b2'].append(lp['b2'])

    stk_w = lambda xs: jnp.stack(xs).astype(MATMUL_DTYPE)               # (L, in, out)
    stk_v = lambda xs: jnp.stack([x.reshape(1, -1) for x in xs]).astype(jnp.float32)
    kp['stack'] = {
        'ln1_w': stk_v(acc['ln1_w']), 'ln1_b': stk_v(acc['ln1_b']),
        'wqkv': stk_w(acc['wqkv']),   'bqkv': stk_v(acc['bqkv']),
        'wo': stk_w(acc['wo']),       'bo': stk_v(acc['bo']),
        'ln2_w': stk_v(acc['ln2_w']), 'ln2_b': stk_v(acc['ln2_b']),
        'w1': stk_w(acc['w1']),       'b1': stk_v(acc['b1']),
        'w2': stk_w(acc['w2']),       'b2': stk_v(acc['b2']),
    }
    return kp


def _pick_seq_pad(S):
    # Lane-dense score matrices (multiple of 128) for realistic ViT sequence
    # lengths; sublane-aligned (multiple of 8) for tiny configs.
    return _round_up(S, 128) if S >= 96 else _round_up(S, 8)


def vit_forward(x, kp, *, patch_size, num_heads, num_classes):
    B = x.shape[0]
    D = kp['conv_w_t'].shape[1]

    # Patch embedding: conv(kernel=stride=patch) == patchify + matmul.
    # Patches go in as bf16 (the kernel multiplies in bf16 anyway) -> half DMA.
    patches = extract_patches(x, patch_size).astype(MATMUL_DTYPE)   # (B*Np, C*P*P)
    tokens = patch_embed(patches, kp['conv_w_t'], kp['conv_b'])
    Np = patches.shape[0] // B
    tokens = tokens.reshape(B, Np, D)

    cls = jnp.broadcast_to(kp['class_token'], (B, 1, D))
    seq = jnp.concatenate([cls, tokens], axis=1) + kp['pos_emb']     # dropout p=0
    S = Np + 1
    S_pad = _pick_seq_pad(S)
    if S_pad != S:
        # Padded key positions are masked to -inf before the softmax in-kernel;
        # padded query rows are dropped at the class-token slice.
        seq = jnp.pad(seq, ((0, 0), (0, S_pad - S), (0, 0)))

    # Fused encoder: grid (batch, layer); residual stream resident in VMEM,
    # stacked weights prefetched across the layer axis by BlockSpec pipelining.
    # TODO(synk): for v7x at batch 1, add an S-tile "parallel" axis (with a
    #             cross-tile key exchange) to use both TensorCores.
    seq = encoder_stack(seq, kp['stack'], num_heads=num_heads, seq_valid=S)

    cls_tok = seq[:, 0]                                    # (B, D)
    return ln_head(cls_tok, kp['ln_w'], kp['ln_b'],
                   kp['head_w'], kp['head_b'], num_classes)


# ----------------------------------------------------------------------------
if __name__ == "__main__":
    image_size, patch_size = 16, 8
    num_layers, num_heads = 2, 4
    hidden_dim, mlp_dim = 32, 64
    num_classes = 8
    batch = 2

    key = jax.random.PRNGKey(0)
    kx, kparam = jax.random.split(key)
    x = jax.random.normal(kx, (batch, 3, image_size, image_size), jnp.float32)

    params = init_params(kparam, image_size=image_size, patch_size=patch_size,
                         num_layers=num_layers, num_heads=num_heads,
                         hidden_dim=hidden_dim, mlp_dim=mlp_dim,
                         num_classes=num_classes)
    kparams = prepare_kernel_params(params, num_heads=num_heads)

    fwd = jax.jit(partial(vit_forward, patch_size=patch_size,
                          num_heads=num_heads, num_classes=num_classes))
    logits = fwd(x, kparams)
    jax.block_until_ready(logits)
    assert logits.shape == (batch, num_classes)
    print("KERNEL_OK")
</pallas_src>

<mosaic_0001>
module attributes {stable_mosaic.version = 11 : i64} {
  func.func @patch_embed_kernel(%arg0: i32, %arg1: memref<8x192xbf16, #tpu.memory_space<vmem>>, %arg2: memref<192x32xbf16, #tpu.memory_space<vmem>>, %arg3: memref<1x32xf32, #tpu.memory_space<vmem>>, %arg4: memref<8x32xf32, #tpu.memory_space<vmem>>) attributes {dimension_semantics = [#tpu.dimension_semantics<parallel>], iteration_bounds = array<i64: 1>, scalar_prefetch = 0 : i64, scratch_operands = 0 : i64, tpu.core_type = #tpu.core_type<tc>, window_params = [{transform_indices = @transform_0, window_bounds = array<i64: 8, 192>}, {pipeline_mode = #tpu.pipeline_mode<synchronous>, transform_indices = @transform_1, window_bounds = array<i64: 192, 32>}, {pipeline_mode = #tpu.pipeline_mode<synchronous>, transform_indices = @transform_2, window_bounds = array<i64: 1, 32>}, {transform_indices = @transform_3, window_bounds = array<i64: 8, 32>}]} {
    %c0 = arith.constant 0 : index
    %c0_0 = arith.constant 0 : index
    %0 = vector.load %arg1[%c0, %c0_0] : memref<8x192xbf16, #tpu.memory_space<vmem>>, vector<8x192xbf16>
    %c0_1 = arith.constant 0 : index
    %c0_2 = arith.constant 0 : index
    %1 = vector.load %arg2[%c0_1, %c0_2] : memref<192x32xbf16, #tpu.memory_space<vmem>>, vector<192x32xbf16>
    %c0_3 = arith.constant 0 : index
    %c0_4 = arith.constant 0 : index
    %2 = vector.load %arg3[%c0_3, %c0_4] : memref<1x32xf32, #tpu.memory_space<vmem>>, vector<1x32xf32>
    %cst = arith.constant dense<0.000000e+00> : vector<8x32xf32>
    %3 = tpu.matmul %0, %1, %cst {dimension_numbers = #tpu.dot_dimension_numbers<[1], [0], [0], [1], [0, 0, 1, 1], [], []>} : vector<8x192xbf16>, vector<192x32xbf16>, vector<8x32xf32> -> vector<8x32xf32>
    %4 = vector.broadcast %2 : vector<1x32xf32> to vector<8x32xf32>
    %5 = arith.addf %3, %4 : vector<8x32xf32>
    %c0_5 = arith.constant 0 : index
    %c0_6 = arith.constant 0 : index
    %6 = vector.load %arg4[%c0_5, %c0_6] : memref<8x32xf32, #tpu.memory_space<vmem>>, vector<8x32xf32>
    tpu.vector_store %arg4[%c0_5, %c0_6], %5 {strides = array<i32>} : memref<8x32xf32, #tpu.memory_space<vmem>>, vector<8x32xf32>,
    return
  }
  func.func @transform_0(%arg0: i32) -> (i32, i32) {
    %c0_i32 = arith.constant 0 : i32
    %c0_i32_0 = arith.constant 0 : i32
    return %arg0, %c0_i32 : i32, i32
  }
  func.func @transform_1(%arg0: i32) -> (i32, i32) {
    %c0_i32 = arith.constant 0 : i32
    %c0_i32_0 = arith.constant 0 : i32
    %c0_i32_1 = arith.constant 0 : i32
    return %c0_i32, %c0_i32_0 : i32, i32
  }
  func.func @transform_2(%arg0: i32) -> (i32, i32) {
    %c0_i32 = arith.constant 0 : i32
    %c0_i32_0 = arith.constant 0 : i32
    %c0_i32_1 = arith.constant 0 : i32
    return %c0_i32, %c0_i32_0 : i32, i32
  }
  func.func @transform_3(%arg0: i32) -> (i32, i32) {
    %c0_i32 = arith.constant 0 : i32
    %c0_i32_0 = arith.constant 0 : i32
    return %arg0, %c0_i32 : i32, i32
  }
}

module attributes {stable_mosaic.version = 11 : i64} {
  func.func @encoder_layer_kernel(%arg0: i32, %arg1: i32, %arg2: memref<1x8x32xf32, #tpu.memory_space<vmem>>, %arg3: memref<1x1x32xf32, #tpu.memory_space<vmem>>, %arg4: memref<1x1x32xf32, #tpu.memory_space<vmem>>, %arg5: memref<1x32x96xbf16, #tpu.memory_space<vmem>>, %arg6: memref<1x1x96xf32, #tpu.memory_space<vmem>>, %arg7: memref<1x32x32xbf16, #tpu.memory_space<vmem>>, %arg8: memref<1x1x32xf32, #tpu.memory_space<vmem>>, %arg9: memref<1x1x32xf32, #tpu.memory_space<vmem>>, %arg10: memref<1x1x32xf32, #tpu.memory_space<vmem>>, %arg11: memref<1x32x64xbf16, #tpu.memory_space<vmem>>, %arg12: memref<1x1x64xf32, #tpu.memory_space<vmem>>, %arg13: memref<1x64x32xbf16, #tpu.memory_space<vmem>>, %arg14: memref<1x1x32xf32, #tpu.memory_space<vmem>>, %arg15: memref<1x8x32xf32, #tpu.memory_space<vmem>>, %arg16: memref<8x32xbf16, #tpu.memory_space<vmem>>) attributes {dimension_semantics = [#tpu.dimension_semantics<parallel>, #tpu.dimension_semantics<arbitrary>], iteration_bounds = array<i64: 2, 2>, scalar_prefetch = 0 : i64, scratch_operands = 1 : i64, tpu.core_type = #tpu.core_type<tc>, window_params = [{transform_indices = @transform_0, window_bounds = array<i64: 1, 8, 32>}, {transform_indices = @transform_1, window_bounds = array<i64: 1, 1, 32>}, {transform_indices = @transform_2, window_bounds = array<i64: 1, 1, 32>}, {transform_indices = @transform_3, window_bounds = array<i64: 1, 32, 96>}, {transform_indices = @transform_4, window_bounds = array<i64: 1, 1, 96>}, {transform_indices = @transform_5, window_bounds = array<i64: 1, 32, 32>}, {transform_indices = @transform_6, window_bounds = array<i64: 1, 1, 32>}, {transform_indices = @transform_7, window_bounds = array<i64: 1, 1, 32>}, {transform_indices = @transform_8, window_bounds = array<i64: 1, 1, 32>}, {transform_indices = @transform_9, window_bounds = array<i64: 1, 32, 64>}, {transform_indices = @transform_10, window_bounds = array<i64: 1, 1, 64>}, {transform_indices = @transform_11, window_bounds = array<i64: 1, 64, 32>}, {transform_indices = @transform_12, window_bounds = array<i64: 1, 1, 32>}, {transform_indices = @transform_13, window_bounds = array<i64: 1, 8, 32>}]} {
    %c0_i32 = arith.constant 0 : i32
    %0 = arith.cmpi eq, %arg1, %c0_i32 : i32
    %1 = arith.extui %0 : i1 to i32
    %c0_i32_0 = arith.constant 0 : i32
    %2 = arith.cmpi ne, %1, %c0_i32_0 : i32
    scf.if %2 {
      %c0_96 = arith.constant 0 : index
      %c0_97 = arith.constant 0 : index
      %c0_98 = arith.constant 0 : index
      %229 = vector.load %arg2[%c0_96, %c0_97, %c0_98] : memref<1x8x32xf32, #tpu.memory_space<vmem>>, vector<1x8x32xf32>
      %c0_99 = arith.constant 0 : index
      %c0_100 = arith.constant 0 : index
      %c0_101 = arith.constant 0 : index
      %230 = vector.load %arg15[%c0_99, %c0_100, %c0_101] : memref<1x8x32xf32, #tpu.memory_space<vmem>>, vector<1x8x32xf32>
      tpu.vector_store %arg15[%c0_99, %c0_100, %c0_101], %229 {strides = array<i32>} : memref<1x8x32xf32, #tpu.memory_space<vmem>>, vector<1x8x32xf32>,
    } else {
    }
    %c0 = arith.constant 0 : index
    %c0_1 = arith.constant 0 : index
    %c0_2 = arith.constant 0 : index
    %3 = vector.load %arg15[%c0, %c0_1, %c0_2] : memref<1x8x32xf32, #tpu.memory_space<vmem>>, vector<1x8x32xf32>
    %4 = vector.shape_cast %3 : vector<1x8x32xf32> to vector<8x32xf32>
    %c0_3 = arith.constant 0 : index
    %c0_4 = arith.constant 0 : index
    %c0_5 = arith.constant 0 : index
    %5 = vector.load %arg3[%c0_3, %c0_4, %c0_5] : memref<1x1x32xf32, #tpu.memory_space<vmem>>, vector<1x1x32xf32>
    %6 = vector.shape_cast %5 : vector<1x1x32xf32> to vector<1x32xf32>
    %c0_6 = arith.constant 0 : index
    %c0_7 = arith.constant 0 : index
    %c0_8 = arith.constant 0 : index
    %7 = vector.load %arg4[%c0_6, %c0_7, %c0_8] : memref<1x1x32xf32, #tpu.memory_space<vmem>>, vector<1x1x32xf32>
    %8 = vector.shape_cast %7 : vector<1x1x32xf32> to vector<1x32xf32>
    %cst = arith.constant dense<0.000000e+00> : vector<8xf32>
    %9 = vector.multi_reduction <add>, %4, %cst [1] : vector<8x32xf32> to vector<8xf32>
    %10 = vector.shape_cast %9 : vector<8xf32> to vector<8x1xf32>
    %cst_9 = arith.constant 3.200000e+01 : f32
    %11 = vector.broadcast %cst_9 : f32 to vector<8x1xf32>
    %12 = arith.divf %10, %11 : vector<8x1xf32>
    %13 = vector.broadcast %12 : vector<8x1xf32> to vector<8x32xf32>
    %14 = arith.subf %4, %13 : vector<8x32xf32>
    %15 = arith.mulf %14, %14 : vector<8x32xf32>
    %cst_10 = arith.constant dense<0.000000e+00> : vector<8xf32>
    %16 = vector.multi_reduction <add>, %15, %cst_10 [1] : vector<8x32xf32> to vector<8xf32>
    %17 = vector.shape_cast %16 : vector<8xf32> to vector<8x1xf32>
    %cst_11 = arith.constant 3.200000e+01 : f32
    %18 = vector.broadcast %cst_11 : f32 to vector<8x1xf32>
    %19 = arith.divf %17, %18 : vector<8x1xf32>
    %cst_12 = arith.constant 9.99999997E-7 : f32
    %20 = vector.broadcast %cst_12 : f32 to vector<8x1xf32>
    %21 = arith.addf %19, %20 : vector<8x1xf32>
    %22 = math.rsqrt %21 : vector<8x1xf32>
    %23 = vector.broadcast %22 : vector<8x1xf32> to vector<8x32xf32>
    %24 = arith.mulf %14, %23 : vector<8x32xf32>
    %25 = vector.broadcast %6 : vector<1x32xf32> to vector<8x32xf32>
    %26 = arith.mulf %24, %25 : vector<8x32xf32>
    %27 = vector.broadcast %8 : vector<1x32xf32> to vector<8x32xf32>
    %28 = arith.addf %26, %27 : vector<8x32xf32>
    %c0_13 = arith.constant 0 : index
    %c0_14 = arith.constant 0 : index
    %c0_15 = arith.constant 0 : index
    %29 = vector.load %arg5[%c0_13, %c0_14, %c0_15] : memref<1x32x96xbf16, #tpu.memory_space<vmem>>, vector<1x32x96xbf16>
    %30 = vector.shape_cast %29 : vector<1x32x96xbf16> to vector<32x96xbf16>
    %c0_16 = arith.constant 0 : index
    %c0_17 = arith.constant 0 : index
    %c0_18 = arith.constant 0 : index
    %31 = vector.load %arg6[%c0_16, %c0_17, %c0_18] : memref<1x1x96xf32, #tpu.memory_space<vmem>>, vector<1x1x96xf32>
    %32 = vector.shape_cast %31 : vector<1x1x96xf32> to vector<1x96xf32>
    %33 = arith.truncf %28 : vector<8x32xf32> to vector<8x32xbf16>
    %cst_19 = arith.constant dense<0.000000e+00> : vector<8x96xf32>
    %34 = tpu.matmul %33, %30, %cst_19 {dimension_numbers = #tpu.dot_dimension_numbers<[1], [0], [0], [1], [0, 0, 1, 1], [], []>} : vector<8x32xbf16>, vector<32x96xbf16>, vector<8x96xf32> -> vector<8x96xf32>
    %35 = vector.broadcast %32 : vector<1x96xf32> to vector<8x96xf32>
    %36 = arith.addf %34, %35 : vector<8x96xf32>
    %37 = tpu.iota {dimensions = array<i32: 1>} : vector<1x8xi32>
    %c5_i32 = arith.constant 5 : i32
    %38 = vector.broadcast %c5_i32 : i32 to vector<1x8xi32>
    %39 = arith.cmpi slt, %37, %38 : vector<1x8xi32>
    %cst_20 = arith.constant 0.000000e+00 : f32
    %cst_21 = arith.constant -1.000000e+30 : f32
    %40 = vector.broadcast %cst_20 : f32 to vector<1x8xf32>
    %41 = vector.broadcast %cst_21 : f32 to vector<1x8xf32>
    %42 = arith.select %39, %40, %41 : vector<1x8xi1>, vector<1x8xf32>
    %43 = vector.extract_strided_slice %36 {offsets = [0, 0], sizes = [8, 8], strides = [1, 1]} : vector<8x96xf32> to vector<8x8xf32>
    %44 = arith.truncf %43 : vector<8x8xf32> to vector<8x8xbf16>
    %45 = vector.extract_strided_slice %36 {offsets = [0, 32], sizes = [8, 8], strides = [1, 1]} : vector<8x96xf32> to vector<8x8xf32>
    %46 = arith.truncf %45 : vector<8x8xf32> to vector<8x8xbf16>
    %47 = vector.extract_strided_slice %36 {offsets = [0, 64], sizes = [8, 8], strides = [1, 1]} : vector<8x96xf32> to vector<8x8xf32>
    %48 = arith.truncf %47 : vector<8x8xf32> to vector<8x8xbf16>
    "tpu.trace_start"() <{level = 10 : i32, message = "qd,kd->qk"}> : () -> ()
    %cst_22 = arith.constant dense<0.000000e+00> : vector<8x8xf32>
    %49 = tpu.matmul %44, %46, %cst_22 {dimension_numbers = #tpu.dot_dimension_numbers<[1], [1], [0], [0], [0, 0, 1, 0], [], []>} : vector<8x8xbf16>, vector<8x8xbf16>, vector<8x8xf32> -> vector<8x8xf32>
    "tpu.trace_stop"() : () -> ()
    %50 = vector.broadcast %42 : vector<1x8xf32> to vector<8x8xf32>
    %51 = arith.addf %49, %50 : vector<8x8xf32>
    %cst_23 = arith.constant dense<0xFF800000> : vector<8xf32>
    %52 = vector.multi_reduction <maximumf>, %51, %cst_23 [1] : vector<8x8xf32> to vector<8xf32>
    %53 = vector.shape_cast %52 : vector<8xf32> to vector<8x1xf32>
    %54 = vector.broadcast %53 : vector<8x1xf32> to vector<8x8xf32>
    %55 = arith.subf %51, %54 : vector<8x8xf32>
    %56 = math.exp %55 : vector<8x8xf32>
    %cst_24 = arith.constant dense<0.000000e+00> : vector<8xf32>
    %57 = vector.multi_reduction <add>, %56, %cst_24 [1] : vector<8x8xf32> to vector<8xf32>
    %58 = vector.shape_cast %57 : vector<8xf32> to vector<8x1xf32>
    %59 = tpu.reciprocal %58 {approx = true} : vector<8x1xf32> -> vector<8x1xf32>
    %60 = vector.broadcast %59 : vector<8x1xf32> to vector<8x8xf32>
    %61 = arith.mulf %56, %60 : vector<8x8xf32>
    %62 = arith.truncf %61 : vector<8x8xf32> to vector<8x8xbf16>
    %cst_25 = arith.constant dense<0.000000e+00> : vector<8x8xf32>
    %63 = tpu.matmul %62, %48, %cst_25 {dimension_numbers = #tpu.dot_dimension_numbers<[1], [0], [0], [1], [0, 0, 1, 1], [], []>} : vector<8x8xbf16>, vector<8x8xbf16>, vector<8x8xf32> -> vector<8x8xf32>
    %64 = arith.truncf %63 : vector<8x8xf32> to vector<8x8xbf16>
    %c0_26 = arith.constant 0 : index
    %c0_27 = arith.constant 0 : index
    %65 = vector.load %arg16[%c0_26, %c0_27] : memref<8x32xbf16, #tpu.memory_space<vmem>>, vector<8x8xbf16>
    tpu.vector_store %arg16[%c0_26, %c0_27], %64 {strides = array<i32>} : memref<8x32xbf16, #tpu.memory_space<vmem>>, vector<8x8xbf16>,
    %66 = vector.extract_strided_slice %36 {offsets = [0, 8], sizes = [8, 8], strides = [1, 1]} : vector<8x96xf32> to vector<8x8xf32>
    %67 = arith.truncf %66 : vector<8x8xf32> to vector<8x8xbf16>
    %68 = vector.extract_strided_slice %36 {offsets = [0, 40], sizes = [8, 8], strides = [1, 1]} : vector<8x96xf32> to vector<8x8xf32>
    %69 = arith.truncf %68 : vector<8x8xf32> to vector<8x8xbf16>
    %70 = vector.extract_strided_slice %36 {offsets = [0, 72], sizes = [8, 8], strides = [1, 1]} : vector<8x96xf32> to vector<8x8xf32>
    %71 = arith.truncf %70 : vector<8x8xf32> to vector<8x8xbf16>
    "tpu.trace_start"() <{level = 10 : i32, message = "qd,kd->qk"}> : () -> ()
    %cst_28 = arith.constant dense<0.000000e+00> : vector<8x8xf32>
    %72 = tpu.matmul %67, %69, %cst_28 {dimension_numbers = #tpu.dot_dimension_numbers<[1], [1], [0], [0], [0, 0, 1, 0], [], []>} : vector<8x8xbf16>, vector<8x8xbf16>, vector<8x8xf32> -> vector<8x8xf32>
    "tpu.trace_stop"() : () -> ()
    %73 = vector.broadcast %42 : vector<1x8xf32> to vector<8x8xf32>
    %74 = arith.addf %72, %73 : vector<8x8xf32>
    %cst_29 = arith.constant dense<0xFF800000> : vector<8xf32>
    %75 = vector.multi_reduction <maximumf>, %74, %cst_29 [1] : vector<8x8xf32> to vector<8xf32>
    %76 = vector.shape_cast %75 : vector<8xf32> to vector<8x1xf32>
    %77 = vector.broadcast %76 : vector<8x1xf32> to vector<8x8xf32>
    %78 = arith.subf %74, %77 : vector<8x8xf32>
    %79 = math.exp %78 : vector<8x8xf32>
    %cst_30 = arith.constant dense<0.000000e+00> : vector<8xf32>
    %80 = vector.multi_reduction <add>, %79, %cst_30 [1] : vector<8x8xf32> to vector<8xf32>
    %81 = vector.shape_cast %80 : vector<8xf32> to vector<8x1xf32>
    %82 = tpu.reciprocal %81 {approx = true} : vector<8x1xf32> -> vector<8x1xf32>
    %83 = vector.broadcast %82 : vector<8x1xf32> to vector<8x8xf32>
    %84 = arith.mulf %79, %83 : vector<8x8xf32>
    %85 = arith.truncf %84 : vector<8x8xf32> to vector<8x8xbf16>
    %cst_31 = arith.constant dense<0.000000e+00> : vector<8x8xf32>
    %86 = tpu.matmul %85, %71, %cst_31 {dimension_numbers = #tpu.dot_dimension_numbers<[1], [0], [0], [1], [0, 0, 1, 1], [], []>} : vector<8x8xbf16>, vector<8x8xbf16>, vector<8x8xf32> -> vector<8x8xf32>
    %87 = arith.truncf %86 : vector<8x8xf32> to vector<8x8xbf16>
    %c0_32 = arith.constant 0 : index
    %c8 = arith.constant 8 : index
    %88 = vector.load %arg16[%c0_32, %c8] : memref<8x32xbf16, #tpu.memory_space<vmem>>, vector<8x8xbf16>
    tpu.vector_store %arg16[%c0_32, %c8], %87 {strides = array<i32>} : memref<8x32xbf16, #tpu.memory_space<vmem>>, vector<8x8xbf16>,
    %89 = vector.extract_strided_slice %36 {offsets = [0, 16], sizes = [8, 8], strides = [1, 1]} : vector<8x96xf32> to vector<8x8xf32>
    %90 = arith.truncf %89 : vector<8x8xf32> to vector<8x8xbf16>
    %91 = vector.extract_strided_slice %36 {offsets = [0, 48], sizes = [8, 8], strides = [1, 1]} : vector<8x96xf32> to vector<8x8xf32>
    %92 = arith.truncf %91 : vector<8x8xf32> to vector<8x8xbf16>
    %93 = vector.extract_strided_slice %36 {offsets = [0, 80], sizes = [8, 8], strides = [1, 1]} : vector<8x96xf32> to vector<8x8xf32>
    %94 = arith.truncf %93 : vector<8x8xf32> to vector<8x8xbf16>
    "tpu.trace_start"() <{level = 10 : i32, message = "qd,kd->qk"}> : () -> ()
    %cst_33 = arith.constant dense<0.000000e+00> : vector<8x8xf32>
    %95 = tpu.matmul %90, %92, %cst_33 {dimension_numbers = #tpu.dot_dimension_numbers<[1], [1], [0], [0], [0, 0, 1, 0], [], []>} : vector<8x8xbf16>, vector<8x8xbf16>, vector<8x8xf32> -> vector<8x8xf32>
    "tpu.trace_stop"() : () -> ()
    %96 = vector.broadcast %42 : vector<1x8xf32> to vector<8x8xf32>
    %97 = arith.addf %95, %96 : vector<8x8xf32>
    %cst_34 = arith.constant dense<0xFF800000> : vector<8xf32>
    %98 = vector.multi_reduction <maximumf>, %97, %cst_34 [1] : vector<8x8xf32> to vector<8xf32>
    %99 = vector.shape_cast %98 : vector<8xf32> to vector<8x1xf32>
    %100 = vector.broadcast %99 : vector<8x1xf32> to vector<8x8xf32>
    %101 = arith.subf %97, %100 : vector<8x8xf32>
    %102 = math.exp %101 : vector<8x8xf32>
    %cst_35 = arith.constant dense<0.000000e+00> : vector<8xf32>
    %103 = vector.multi_reduction <add>, %102, %cst_35 [1] : vector<8x8xf32> to vector<8xf32>
    %104 = vector.shape_cast %103 : vector<8xf32> to vector<8x1xf32>
    %105 = tpu.reciprocal %104 {approx = true} : vector<8x1xf32> -> vector<8x1xf32>
    %106 = vector.broadcast %105 : vector<8x1xf32> to vector<8x8xf32>
    %107 = arith.mulf %102, %106 : vector<8x8xf32>
    %108 = arith.truncf %107 : vector<8x8xf32> to vector<8x8xbf16>
    %cst_36 = arith.constant dense<0.000000e+00> : vector<8x8xf32>
    %109 = tpu.matmul %108, %94, %cst_36 {dimension_numbers = #tpu.dot_dimension_numbers<[1], [0], [0], [1], [0, 0, 1, 1], [], []>} : vector<8x8xbf16>, vector<8x8xbf16>, vector<8x8xf32> -> vector<8x8xf32>
    %110 = arith.truncf %109 : vector<8x8xf32> to vector<8x8xbf16>
    %c0_37 = arith.constant 0 : index
    %c16 = arith.constant 16 : index
    %111 = vector.load %arg16[%c0_37, %c16] : memref<8x32xbf16, #tpu.memory_space<vmem>>, vector<8x8xbf16>
    tpu.vector_store %arg16[%c0_37, %c16], %110 {strides = array<i32>} : memref<8x32xbf16, #tpu.memory_space<vmem>>, vector<8x8xbf16>,
    %112 = vector.extract_strided_slice %36 {offsets = [0, 24], sizes = [8, 8], strides = [1, 1]} : vector<8x96xf32> to vector<8x8xf32>
    %113 = arith.truncf %112 : vector<8x8xf32> to vector<8x8xbf16>
    %114 = vector.extract_strided_slice %36 {offsets = [0, 56], sizes = [8, 8], strides = [1, 1]} : vector<8x96xf32> to vector<8x8xf32>
    %115 = arith.truncf %114 : vector<8x8xf32> to vector<8x8xbf16>
    %116 = vector.extract_strided_slice %36 {offsets = [0, 88], sizes = [8, 8], strides = [1, 1]} : vector<8x96xf32> to vector<8x8xf32>
    %117 = arith.truncf %116 : vector<8x8xf32> to vector<8x8xbf16>
    "tpu.trace_start"() <{level = 10 : i32, message = "qd,kd->qk"}> : () -> ()
    %cst_38 = arith.constant dense<0.000000e+00> : vector<8x8xf32>
    %118 = tpu.matmul %113, %115, %cst_38 {dimension_numbers = #tpu.dot_dimension_numbers<[1], [1], [0], [0], [0, 0, 1, 0], [], []>} : vector<8x8xbf16>, vector<8x8xbf16>, vector<8x8xf32> -> vector<8x8xf32>
    "tpu.trace_stop"() : () -> ()
    %119 = vector.broadcast %42 : vector<1x8xf32> to vector<8x8xf32>
    %120 = arith.addf %118, %119 : vector<8x8xf32>
    %cst_39 = arith.constant dense<0xFF800000> : vector<8xf32>
    %121 = vector.multi_reduction <maximumf>, %120, %cst_39 [1] : vector<8x8xf32> to vector<8xf32>
    %122 = vector.shape_cast %121 : vector<8xf32> to vector<8x1xf32>
    %123 = vector.broadcast %122 : vector<8x1xf32> to vector<8x8xf32>
    %124 = arith.subf %120, %123 : vector<8x8xf32>
    %125 = math.exp %124 : vector<8x8xf32>
    %cst_40 = arith.constant dense<0.000000e+00> : vector<8xf32>
    %126 = vector.multi_reduction <add>, %125, %cst_40 [1] : vector<8x8xf32> to vector<8xf32>
    %127 = vector.shape_cast %126 : vector<8xf32> to vector<8x1xf32>
    %128 = tpu.reciprocal %127 {approx = true} : vector<8x1xf32> -> vector<8x1xf32>
    %129 = vector.broadcast %128 : vector<8x1xf32> to vector<8x8xf32>
    %130 = arith.mulf %125, %129 : vector<8x8xf32>
    %131 = arith.truncf %130 : vector<8x8xf32> to vector<8x8xbf16>
    %cst_41 = arith.constant dense<0.000000e+00> : vector<8x8xf32>
    %132 = tpu.matmul %131, %117, %cst_41 {dimension_numbers = #tpu.dot_dimension_numbers<[1], [0], [0], [1], [0, 0, 1, 1], [], []>} : vector<8x8xbf16>, vector<8x8xbf16>, vector<8x8xf32> -> vector<8x8xf32>
    %133 = arith.truncf %132 : vector<8x8xf32> to vector<8x8xbf16>
    %c0_42 = arith.constant 0 : index
    %c24 = arith.constant 24 : index
    %134 = vector.load %arg16[%c0_42, %c24] : memref<8x32xbf16, #tpu.memory_space<vmem>>, vector<8x8xbf16>
    tpu.vector_store %arg16[%c0_42, %c24], %133 {strides = array<i32>} : memref<8x32xbf16, #tpu.memory_space<vmem>>, vector<8x8xbf16>,
    %c0_43 = arith.constant 0 : index
    %c0_44 = arith.constant 0 : index
    %135 = vector.load %arg16[%c0_43, %c0_44] : memref<8x32xbf16, #tpu.memory_space<vmem>>, vector<8x32xbf16>
    %c0_45 = arith.constant 0 : index
    %c0_46 = arith.constant 0 : index
    %c0_47 = arith.constant 0 : index
    %136 = vector.load %arg7[%c0_45, %c0_46, %c0_47] : memref<1x32x32xbf16, #tpu.memory_space<vmem>>, vector<1x32x32xbf16>
    %137 = vector.shape_cast %136 : vector<1x32x32xbf16> to vector<32x32xbf16>
    %c0_48 = arith.constant 0 : index
    %c0_49 = arith.constant 0 : index
    %c0_50 = arith.constant 0 : index
    %138 = vector.load %arg8[%c0_48, %c0_49, %c0_50] : memref<1x1x32xf32, #tpu.memory_space<vmem>>, vector<1x1x32xf32>
    %139 = vector.shape_cast %138 : vector<1x1x32xf32> to vector<1x32xf32>
    %cst_51 = arith.constant dense<0.000000e+00> : vector<8x32xf32>
    %140 = tpu.matmul %135, %137, %cst_51 {dimension_numbers = #tpu.dot_dimension_numbers<[1], [0], [0], [1], [0, 0, 1, 1], [], []>} : vector<8x32xbf16>, vector<32x32xbf16>, vector<8x32xf32> -> vector<8x32xf32>
    %141 = vector.broadcast %139 : vector<1x32xf32> to vector<8x32xf32>
    %142 = arith.addf %140, %141 : vector<8x32xf32>
    %143 = arith.addf %4, %142 : vector<8x32xf32>
    %c0_52 = arith.constant 0 : index
    %c0_53 = arith.constant 0 : index
    %c0_54 = arith.constant 0 : index
    %144 = vector.load %arg9[%c0_52, %c0_53, %c0_54] : memref<1x1x32xf32, #tpu.memory_space<vmem>>, vector<1x1x32xf32>
    %145 = vector.shape_cast %144 : vector<1x1x32xf32> to vector<1x32xf32>
    %c0_55 = arith.constant 0 : index
    %c0_56 = arith.constant 0 : index
    %c0_57 = arith.constant 0 : index
    %146 = vector.load %arg10[%c0_55, %c0_56, %c0_57] : memref<1x1x32xf32, #tpu.memory_space<vmem>>, vector<1x1x32xf32>
    %147 = vector.shape_cast %146 : vector<1x1x32xf32> to vector<1x32xf32>
    %cst_58 = arith.constant dense<0.000000e+00> : vector<8xf32>
    %148 = vector.multi_reduction <add>, %143, %cst_58 [1] : vector<8x32xf32> to vector<8xf32>
    %149 = vector.shape_cast %148 : vector<8xf32> to vector<8x1xf32>
    %cst_59 = arith.constant 3.200000e+01 : f32
    %150 = vector.broadcast %cst_59 : f32 to vector<8x1xf32>
    %151 = arith.divf %149, %150 : vector<8x1xf32>
    %152 = vector.broadcast %151 : vector<8x1xf32> to vector<8x32xf32>
    %153 = arith.subf %143, %152 : vector<8x32xf32>
    %154 = arith.mulf %153, %153 : vector<8x32xf32>
    %cst_60 = arith.constant dense<0.000000e+00> : vector<8xf32>
    %155 = vector.multi_reduction <add>, %154, %cst_60 [1] : vector<8x32xf32> to vector<8xf32>
    %156 = vector.shape_cast %155 : vector<8xf32> to vector<8x1xf32>
    %cst_61 = arith.constant 3.200000e+01 : f32
    %157 = vector.broadcast %cst_61 : f32 to vector<8x1xf32>
    %158 = arith.divf %156, %157 : vector<8x1xf32>
    %cst_62 = arith.constant 9.99999997E-7 : f32
    %159 = vector.broadcast %cst_62 : f32 to vector<8x1xf32>
    %160 = arith.addf %158, %159 : vector<8x1xf32>
    %161 = math.rsqrt %160 : vector<8x1xf32>
    %162 = vector.broadcast %161 : vector<8x1xf32> to vector<8x32xf32>
    %163 = arith.mulf %153, %162 : vector<8x32xf32>
    %164 = vector.broadcast %145 : vector<1x32xf32> to vector<8x32xf32>
    %165 = arith.mulf %163, %164 : vector<8x32xf32>
    %166 = vector.broadcast %147 : vector<1x32xf32> to vector<8x32xf32>
    %167 = arith.addf %165, %166 : vector<8x32xf32>
    %c0_63 = arith.constant 0 : index
    %c0_64 = arith.constant 0 : index
    %c0_65 = arith.constant 0 : index
    %168 = vector.load %arg11[%c0_63, %c0_64, %c0_65] : memref<1x32x64xbf16, #tpu.memory_space<vmem>>, vector<1x32x64xbf16>
    %169 = vector.shape_cast %168 : vector<1x32x64xbf16> to vector<32x64xbf16>
    %c0_66 = arith.constant 0 : index
    %c0_67 = arith.constant 0 : index
    %c0_68 = arith.constant 0 : index
    %170 = vector.load %arg12[%c0_66, %c0_67, %c0_68] : memref<1x1x64xf32, #tpu.memory_space<vmem>>, vector<1x1x64xf32>
    %171 = vector.shape_cast %170 : vector<1x1x64xf32> to vector<1x64xf32>
    %172 = arith.truncf %167 : vector<8x32xf32> to vector<8x32xbf16>
    %cst_69 = arith.constant dense<0.000000e+00> : vector<8x64xf32>
    %173 = tpu.matmul %172, %169, %cst_69 {dimension_numbers = #tpu.dot_dimension_numbers<[1], [0], [0], [1], [0, 0, 1, 1], [], []>} : vector<8x32xbf16>, vector<32x64xbf16>, vector<8x64xf32> -> vector<8x64xf32>
    %174 = vector.broadcast %171 : vector<1x64xf32> to vector<8x64xf32>
    %175 = arith.addf %173, %174 : vector<8x64xf32>
    %cst_70 = arith.constant 5.000000e-01 : f32
    %176 = vector.broadcast %cst_70 : f32 to vector<8x64xf32>
    %177 = arith.mulf %176, %175 : vector<8x64xf32>
    %cst_71 = arith.constant 0.707106769 : f32
    %178 = vector.broadcast %cst_71 : f32 to vector<8x64xf32>
    %179 = arith.mulf %175, %178 : vector<8x64xf32>
    %cst_72 = arith.constant 0.000000e+00 : f32
    %180 = vector.broadcast %cst_72 : f32 to vector<8x64xf32>
    %181 = arith.cmpf oge, %179, %180 : vector<8x64xf32>
    %cst_73 = arith.constant 1.000000e+00 : f32
    %cst_74 = arith.constant -1.000000e+00 : f32
    %182 = vector.broadcast %cst_73 : f32 to vector<8x64xf32>
    %183 = vector.broadcast %cst_74 : f32 to vector<8x64xf32>
    %184 = arith.select %181, %182, %183 : vector<8x64xi1>, vector<8x64xf32>
    %185 = math.absf %179 : vector<8x64xf32>
    %cst_75 = arith.constant 0.327591091 : f32
    %186 = vector.broadcast %cst_75 : f32 to vector<8x64xf32>
    %187 = arith.mulf %186, %185 : vector<8x64xf32>
    %cst_76 = arith.constant 1.000000e+00 : f32
    %188 = vector.broadcast %cst_76 : f32 to vector<8x64xf32>
    %189 = arith.addf %188, %187 : vector<8x64xf32>
    %cst_77 = arith.constant 1.000000e+00 : f32
    %190 = vector.broadcast %cst_77 : f32 to vector<8x64xf32>
    %191 = arith.divf %190, %189 : vector<8x64xf32>
    %cst_78 = arith.constant 1.06140542 : f32
    %192 = vector.broadcast %cst_78 : f32 to vector<8x64xf32>
    %193 = arith.mulf %192, %191 : vector<8x64xf32>
    %cst_79 = arith.constant -1.45315206 : f32
    %194 = vector.broadcast %cst_79 : f32 to vector<8x64xf32>
    %195 = arith.addf %193, %194 : vector<8x64xf32>
    %196 = arith.mulf %195, %191 : vector<8x64xf32>
    %cst_80 = arith.constant 1.42141378 : f32
    %197 = vector.broadcast %cst_80 : f32 to vector<8x64xf32>
    %198 = arith.addf %196, %197 : vector<8x64xf32>
    %199 = arith.mulf %198, %191 : vector<8x64xf32>
    %cst_81 = arith.constant -0.284496725 : f32
    %200 = vector.broadcast %cst_81 : f32 to vector<8x64xf32>
    %201 = arith.addf %199, %200 : vector<8x64xf32>
    %202 = arith.mulf %201, %191 : vector<8x64xf32>
    %cst_82 = arith.constant 0.254829586 : f32
    %203 = vector.broadcast %cst_82 : f32 to vector<8x64xf32>
    %204 = arith.addf %202, %203 : vector<8x64xf32>
    %205 = arith.mulf %204, %191 : vector<8x64xf32>
    %cst_83 = arith.constant 0.000000e+00 : f32
    %206 = vector.broadcast %cst_83 : f32 to vector<8x64xf32>
    %207 = arith.subf %206, %185 : vector<8x64xf32>
    %208 = arith.mulf %207, %185 : vector<8x64xf32>
    %209 = math.exp %208 : vector<8x64xf32>
    %210 = arith.mulf %205, %209 : vector<8x64xf32>
    %cst_84 = arith.constant 1.000000e+00 : f32
    %211 = vector.broadcast %cst_84 : f32 to vector<8x64xf32>
    %212 = arith.subf %211, %210 : vector<8x64xf32>
    %213 = arith.mulf %184, %212 : vector<8x64xf32>
    %cst_85 = arith.constant 1.000000e+00 : f32
    %214 = vector.broadcast %cst_85 : f32 to vector<8x64xf32>
    %215 = arith.addf %214, %213 : vector<8x64xf32>
    %216 = arith.mulf %177, %215 : vector<8x64xf32>
    %c0_86 = arith.constant 0 : index
    %c0_87 = arith.constant 0 : index
    %c0_88 = arith.constant 0 : index
    %217 = vector.load %arg13[%c0_86, %c0_87, %c0_88] : memref<1x64x32xbf16, #tpu.memory_space<vmem>>, vector<1x64x32xbf16>
    %218 = vector.shape_cast %217 : vector<1x64x32xbf16> to vector<64x32xbf16>
    %c0_89 = arith.constant 0 : index
    %c0_90 = arith.constant 0 : index
    %c0_91 = arith.constant 0 : index
    %219 = vector.load %arg14[%c0_89, %c0_90, %c0_91] : memref<1x1x32xf32, #tpu.memory_space<vmem>>, vector<1x1x32xf32>
    %220 = vector.shape_cast %219 : vector<1x1x32xf32> to vector<1x32xf32>
    %221 = arith.truncf %216 : vector<8x64xf32> to vector<8x64xbf16>
    %cst_92 = arith.constant dense<0.000000e+00> : vector<8x32xf32>
    %222 = tpu.matmul %221, %218, %cst_92 {dimension_numbers = #tpu.dot_dimension_numbers<[1], [0], [0], [1], [0, 0, 1, 1], [], []>} : vector<8x64xbf16>, vector<64x32xbf16>, vector<8x32xf32> -> vector<8x32xf32>
    %223 = vector.broadcast %220 : vector<1x32xf32> to vector<8x32xf32>
    %224 = arith.addf %222, %223 : vector<8x32xf32>
    %225 = arith.addf %143, %224 : vector<8x32xf32>
    %c0_93 = arith.constant 0 : index
    %c0_94 = arith.constant 0 : index
    %c0_95 = arith.constant 0 : index
    %226 = vector.load %arg15[%c0_93, %c0_94, %c0_95] : memref<1x8x32xf32, #tpu.memory_space<vmem>>, vector<1x8x32xf32>
    %227 = vector.shape_cast %226 : vector<1x8x32xf32> to vector<8x32xf32>
    %228 = vector.shape_cast %225 : vector<8x32xf32> to vector<1x8x32xf32>
    tpu.vector_store %arg15[%c0_93, %c0_94, %c0_95], %228 {strides = array<i32>} : memref<1x8x32xf32, #tpu.memory_space<vmem>>, vector<1x8x32xf32>,
    return
  }
  func.func @transform_0(%arg0: i32, %arg1: i32) -> (i32, i32, i32) {
    %c0_i32 = arith.constant 0 : i32
    %c0_i32_0 = arith.constant 0 : i32
    %c0_i32_1 = arith.constant 0 : i32
    return %arg0, %c0_i32, %c0_i32_0 : i32, i32, i32
  }
  func.func @transform_1(%arg0: i32, %arg1: i32) -> (i32, i32, i32) {
    %c0_i32 = arith.constant 0 : i32
    %c0_i32_0 = arith.constant 0 : i32
    %c0_i32_1 = arith.constant 0 : i32
    return %arg1, %c0_i32, %c0_i32_0 : i32, i32, i32
  }
  func.func @transform_2(%arg0: i32, %arg1: i32) -> (i32, i32, i32) {
    %c0_i32 = arith.constant 0 : i32
    %c0_i32_0 = arith.constant 0 : i32
    %c0_i32_1 = arith.constant 0 : i32
    return %arg1, %c0_i32, %c0_i32_0 : i32, i32, i32
  }
  func.func @transform_3(%arg0: i32, %arg1: i32) -> (i32, i32, i32) {
    %c0_i32 = arith.constant 0 : i32
    %c0_i32_0 = arith.constant 0 : i32
    %c0_i32_1 = arith.constant 0 : i32
    return %arg1, %c0_i32, %c0_i32_0 : i32, i32, i32
  }
  func.func @transform_4(%arg0: i32, %arg1: i32) -> (i32, i32, i32) {
    %c0_i32 = arith.constant 0 : i32
    %c0_i32_0 = arith.constant 0 : i32
    %c0_i32_1 = arith.constant 0 : i32
    return %arg1, %c0_i32, %c0_i32_0 : i32, i32, i32
  }
  func.func @transform_5(%arg0: i32, %arg1: i32) -> (i32, i32, i32) {
    %c0_i32 = arith.constant 0 : i32
    %c0_i32_0 = arith.constant 0 : i32
    %c0_i32_1 = arith.constant 0 : i32
    return %arg1, %c0_i32, %c0_i32_0 : i32, i32, i32
  }
  func.func @transform_6(%arg0: i32, %arg1: i32) -> (i32, i32, i32) {
    %c0_i32 = arith.constant 0 : i32
    %c0_i32_0 = arith.constant 0 : i32
    %c0_i32_1 = arith.constant 0 : i32
    return %arg1, %c0_i32, %c0_i32_0 : i32, i32, i32
  }
  func.func @transform_7(%arg0: i32, %arg1: i32) -> (i32, i32, i32) {
    %c0_i32 = arith.constant 0 : i32
    %c0_i32_0 = arith.constant 0 : i32
    %c0_i32_1 = arith.constant 0 : i32
    return %arg1, %c0_i32, %c0_i32_0 : i32, i32, i32
  }
  func.func @transform_8(%arg0: i32, %arg1: i32) -> (i32, i32, i32) {
    %c0_i32 = arith.constant 0 : i32
    %c0_i32_0 = arith.constant 0 : i32
    %c0_i32_1 = arith.constant 0 : i32
    return %arg1, %c0_i32, %c0_i32_0 : i32, i32, i32
  }
  func.func @transform_9(%arg0: i32, %arg1: i32) -> (i32, i32, i32) {
    %c0_i32 = arith.constant 0 : i32
    %c0_i32_0 = arith.constant 0 : i32
    %c0_i32_1 = arith.constant 0 : i32
    return %arg1, %c0_i32, %c0_i32_0 : i32, i32, i32
  }
  func.func @transform_10(%arg0: i32, %arg1: i32) -> (i32, i32, i32) {
    %c0_i32 = arith.constant 0 : i32
    %c0_i32_0 = arith.constant 0 : i32
    %c0_i32_1 = arith.constant 0 : i32
    return %arg1, %c0_i32, %c0_i32_0 : i32, i32, i32
  }
  func.func @transform_11(%arg0: i32, %arg1: i32) -> (i32, i32, i32) {
    %c0_i32 = arith.constant 0 : i32
    %c0_i32_0 = arith.constant 0 : i32
    %c0_i32_1 = arith.constant 0 : i32
    return %arg1, %c0_i32, %c0_i32_0 : i32, i32, i32
  }
  func.func @transform_12(%arg0: i32, %arg1: i32) -> (i32, i32, i32) {
    %c0_i32 = arith.constant 0 : i32
    %c0_i32_0 = arith.constant 0 : i32
    %c0_i32_1 = arith.constant 0 : i32
    return %arg1, %c0_i32, %c0_i32_0 : i32, i32, i32
  }
  func.func @transform_13(%arg0: i32, %arg1: i32) -> (i32, i32, i32) {
    %c0_i32 = arith.constant 0 : i32
    %c0_i32_0 = arith.constant 0 : i32
    %c0_i32_1 = arith.constant 0 : i32
    return %arg0, %c0_i32, %c0_i32_0 : i32, i32, i32
  }
}

module attributes {stable_mosaic.version = 11 : i64} {
  func.func @ln_head_kernel(%arg0: memref<2x32xf32, #tpu.memory_space<vmem>>, %arg1: memref<1x32xf32, #tpu.memory_space<vmem>>, %arg2: memref<1x32xf32, #tpu.memory_space<vmem>>, %arg3: memref<32x128xbf16, #tpu.memory_space<vmem>>, %arg4: memref<1x128xf32, #tpu.memory_space<vmem>>, %arg5: memref<2x128xf32, #tpu.memory_space<vmem>>) attributes {dimension_semantics = [], scalar_prefetch = 0 : i64, scratch_operands = 0 : i64, tpu.core_type = #tpu.core_type<tc>} {
    %c0 = arith.constant 0 : index
    %c0_0 = arith.constant 0 : index
    %0 = vector.load %arg0[%c0, %c0_0] : memref<2x32xf32, #tpu.memory_space<vmem>>, vector<2x32xf32>
    %c0_1 = arith.constant 0 : index
    %c0_2 = arith.constant 0 : index
    %1 = vector.load %arg1[%c0_1, %c0_2] : memref<1x32xf32, #tpu.memory_space<vmem>>, vector<1x32xf32>
    %c0_3 = arith.constant 0 : index
    %c0_4 = arith.constant 0 : index
    %2 = vector.load %arg2[%c0_3, %c0_4] : memref<1x32xf32, #tpu.memory_space<vmem>>, vector<1x32xf32>
    %cst = arith.constant dense<0.000000e+00> : vector<2xf32>
    %3 = vector.multi_reduction <add>, %0, %cst [1] : vector<2x32xf32> to vector<2xf32>
    %4 = vector.shape_cast %3 : vector<2xf32> to vector<2x1xf32>
    %cst_5 = arith.constant 3.200000e+01 : f32
    %5 = vector.broadcast %cst_5 : f32 to vector<2x1xf32>
    %6 = arith.divf %4, %5 : vector<2x1xf32>
    %7 = vector.broadcast %6 : vector<2x1xf32> to vector<2x32xf32>
    %8 = arith.subf %0, %7 : vector<2x32xf32>
    %9 = arith.mulf %8, %8 : vector<2x32xf32>
    %cst_6 = arith.constant dense<0.000000e+00> : vector<2xf32>
    %10 = vector.multi_reduction <add>, %9, %cst_6 [1] : vector<2x32xf32> to vector<2xf32>
    %11 = vector.shape_cast %10 : vector<2xf32> to vector<2x1xf32>
    %cst_7 = arith.constant 3.200000e+01 : f32
    %12 = vector.broadcast %cst_7 : f32 to vector<2x1xf32>
    %13 = arith.divf %11, %12 : vector<2x1xf32>
    %cst_8 = arith.constant 9.99999997E-7 : f32
    %14 = vector.broadcast %cst_8 : f32 to vector<2x1xf32>
    %15 = arith.addf %13, %14 : vector<2x1xf32>
    %16 = math.rsqrt %15 : vector<2x1xf32>
    %17 = vector.broadcast %16 : vector<2x1xf32> to vector<2x32xf32>
    %18 = arith.mulf %8, %17 : vector<2x32xf32>
    %19 = vector.broadcast %1 : vector<1x32xf32> to vector<2x32xf32>
    %20 = arith.mulf %18, %19 : vector<2x32xf32>
    %21 = vector.broadcast %2 : vector<1x32xf32> to vector<2x32xf32>
    %22 = arith.addf %20, %21 : vector<2x32xf32>
    %c0_9 = arith.constant 0 : index
    %c0_10 = arith.constant 0 : index
    %23 = vector.load %arg3[%c0_9, %c0_10] : memref<32x128xbf16, #tpu.memory_space<vmem>>, vector<32x128xbf16>
    %c0_11 = arith.constant 0 : index
    %c0_12 = arith.constant 0 : index
    %24 = vector.load %arg4[%c0_11, %c0_12] : memref<1x128xf32, #tpu.memory_space<vmem>>, vector<1x128xf32>
    %25 = arith.truncf %22 : vector<2x32xf32> to vector<2x32xbf16>
    %cst_13 = arith.constant dense<0.000000e+00> : vector<2x128xf32>
    %26 = tpu.matmul %25, %23, %cst_13 {dimension_numbers = #tpu.dot_dimension_numbers<[1], [0], [0], [1], [0, 0, 1, 1], [], []>} : vector<2x32xbf16>, vector<32x128xbf16>, vector<2x128xf32> -> vector<2x128xf32>
    %27 = vector.broadcast %24 : vector<1x128xf32> to vector<2x128xf32>
    %28 = arith.addf %26, %27 : vector<2x128xf32>
    %c0_14 = arith.constant 0 : index
    %c0_15 = arith.constant 0 : index
    %29 = vector.load %arg5[%c0_14, %c0_15] : memref<2x128xf32, #tpu.memory_space<vmem>>, vector<2x128xf32>
    tpu.vector_store %arg5[%c0_14, %c0_15], %28 {strides = array<i32>} : memref<2x128xf32, #tpu.memory_space<vmem>>, vector<2x128xf32>,
    return
  }
}

</mosaic_0001>

<bundles_post_ra>
// kernel: vit_forward.3
= control target key start
LH: loop header
LB: loop body
LE: loop exit
PB: predicated region body
PF: predicated region fallthrough
CT: control target
= control target key end

     0   :  { %v206_v0 = vmov 0   ;;  %vm125_vm0 = vcmask 523264   ;;  %vm169_vm1 = vcmask 261120   ;;  %s272_s1 = inlined_call_operand.vmem [shape: bf16[192,32], index: 1, kind: input, shape index: {}]   ;;  %s273_s0 = inlined_call_operand.vmem [shape: bf16[8,192], index: 0, kind: input, shape index: {}]   ;;  %s274_s2 = inlined_call_operand.vmem [shape: f32[1,32], index: 2, kind: input, shape index: {}]   ;;  %s275_s3 = inlined_call_operand.vmem [shape: f32[8,32], index: 3, kind: output, shape index: {}]  }
   0x1   :  { %129 = vmatprep.subr.bf16.mxu0 %v206_v0  ;;  %v192_v1 = vld [vmem:[%s272_s1] sm:$0xff]   ;;  %v193_v2 = vld [vmem:[%s272_s1 + $0x8] sm:$0xff]   ;;  %v194_v3 = vld [vmem:[%s272_s1 + $0x10] sm:$0xff]  }
   0x2   :  { %130 = vmatpush1.bf16.msra.mxu0 %v192_v1  ;;  %v195_v4 = vld [vmem:[%s272_s1 + $0x18] sm:$0xff]   ;;  %v15_v5 = vld [vmem:[%s273_s0] sm:$0xff]  ;;  %v197_v8 = vld [vmem:[%s272_s1 + $0x28] sm:$0xff]  }
   0x3   :  { %131 = vmatprep.subr.bf16.mxu0 %v206_v0  ;;  %v177_v6 = vcombine.high %v15_v5, %v15_v5  ;;  %v196_v7 = vld [vmem:[%s272_s1 + $0x20] sm:$0xff]   ;;  %v198_v9 = vld [vmem:[%s272_s1 + $0x30] sm:$0xff]   ;;  %v199_v10 = vld [vmem:[%s272_s1 + $0x38] sm:$0xff]   ;;  %v176_v15 = vcombine.low %v15_v5, %v15_v5 }
   0x4   :  { %v200_v11 = vld [vmem:[%s272_s1 + $0x40] sm:$0xff]   ;;  %v201_v12 = vld [vmem:[%s272_s1 + $0x48] sm:$0xff]   ;;  %v202_v13 = vld [vmem:[%s272_s1 + $0x50] sm:$0xff]  }
   0x5   :  { %190 = vmatprep.mubr.msk.bf16.mxu0 %vm125_vm0, %v177_v6  ;;  %v203_v14 = vld [vmem:[%s272_s1 + $0x58] sm:$0xff]   ;;  %v175_v16 = vld [vmem:[%s274_s2] ss:$0 sm:$0xff] }
   0x6   :  { %132 = vmatpush1.bf16.msra.mxu0 %v193_v2 }
   0x7   :  { %133 = vmatprep.subr.bf16.mxu0 %v206_v0 }
   0xa   :  { %134 = vmatpush1.bf16.msra.mxu0 %v194_v3 }
   0xb   :  { %135 = vmatprep.subr.bf16.mxu0 %v206_v0 }
   0xe   :  { %136 = vmatpush1.bf16.msra.mxu0 %v195_v4 }
   0xf   :  { %137 = vmatprep.subr.bf16.mxu0 %v206_v0 }
  0x12   :  { %138 = vmatpush1.bf16.msra.mxu0 %v196_v7 }
  0x13   :  { %139 = vmatprep.subr.bf16.mxu0 %v206_v0 }
  0x16   :  { %140 = vmatpush1.bf16.msra.mxu0 %v197_v8 }
  0x17   :  { %141 = vmatprep.subr.bf16.mxu0 %v206_v0 }
  0x1a   :  { %142 = vmatpush1.bf16.msra.mxu0 %v198_v9 }
  0x1b   :  { %143 = vmatprep.subr.bf16.mxu0 %v206_v0 }
  0x1e   :  { %144 = vmatpush1.bf16.msra.mxu0 %v199_v10 }
  0x1f   :  { %145 = vmatprep.subr.bf16.mxu0 %v206_v0 }
  0x22   :  { %146 = vmatpush1.bf16.msra.mxu0 %v200_v11 }
  0x23   :  { %147 = vmatprep.subr.bf16.mxu0 %v206_v0 }
  0x26   :  { %148 = vmatpush1.bf16.msra.mxu0 %v201_v12 }
  0x27   :  { %149 = vmatprep.subr.bf16.mxu0 %v206_v0 }
  0x2a   :  { %150 = vmatpush1.bf16.msra.mxu0 %v202_v13 }
  0x2b   :  { %151 = vmatprep.subr.bf16.mxu0 %v206_v0 }
  0x2e   :  { %152 = vmatpush1.bf16.msra.mxu0 %v203_v14 }
  0x31   :  { %162 = vmatmul.mubr.bf16.vlgmr.msra.gmra.mrb[0].mxu0 %v176_v15 }
 0x104   :  { %v163_v17 = vpop.f32.mrb[0].mxu0 }
 0x105   :  { %v164_v18 = vadd.f32 %v175_v16, %v163_v17  ;;  %v165_v19 = vpop.f32.mrb[1].mxu0 }
 0x106   :  { %v166_v20 = vpop.f32.mrb[2].mxu0 }
 0x107   :  { %170 = vst.msk [vmem:[%s275_s3] sm:$0xff] %vm169_vm1, %v164_v18  ;;  %v167_v21 = vpop.f32.mrb[3].mxu0 }

// kernel: vit_forward.5
= control target key start
LH: loop header
LB: loop body
LE: loop exit
PB: predicated region body
PF: predicated region fallthrough
CT: control target
= control target key end

     0   :  { %vm25_vm0 = vcmask 254976   ;;  %s248_s0 = inlined_call_operand.vmem [shape: f32[2,32], index: 0, kind: input, shape index: {}]   ;;  %s249_s1 = inlined_call_operand.vmem [shape: f32[1,32], index: 1, kind: input, shape index: {}]   ;;  %s250_s2 = inlined_call_operand.vmem [shape: f32[1,32], index: 2, kind: input, shape index: {}]   ;;  %s251_s3 = inlined_call_operand.vmem [shape: bf16[32,128], index: 3, kind: input, shape index: {}]   ;;  %s252_s4 = inlined_call_operand.vmem [shape: f32[1,128], index: 4, kind: input, shape index: {}]   ;;  %s253_s5 = inlined_call_operand.hbm [shape: f32[2,128], index: 5, kind: output, shape index: {}]  }
   0x1   :  { %v22_v0 = vld [vmem:[%s248_s0] sm:$0x3] }
   0x2   :  { %v26_v1 = vsel %vm25_vm0, %v22_v0, 0.0 }
   0x3   :  { %27 = vadd.xlane.f32.xlu0 %v26_v1 }
   0x4   :  { %10 = vsyncpa [#allocation3], 0  ;;  %v157_v7 = vld [vmem:[%s251_s3] sm:$0xff]   ;;  %v185_v8 = vmov 0.0   ;;  %v158_v9 = vld [vmem:[%s251_s3 + $0x8] sm:$0xff]   ;;  %vm186_vm1 = vmmov 0  }
   0x5   :  { %146 = vmatprep.subr.bf16.mxu0 %v185_v8  ;;  %150 = vmatprep.mubr.msk.bf16.mxu0 %vm186_vm1, %v185_v8  ;;  %v137_v14 = vld [vmem:[%s249_s1] ss:$0 sm:$0xff]  ;;  %vm78_vm2 = vcmask 261120   ;;  %s187_s28 = smov [#allocation2]  }
   0x6   :  { %147 = vmatpush3.bf16.msra.mxu0 %v157_v7  ;;  %v138_v16 = vld [vmem:[%s250_s2] ss:$0 sm:$0xff]  ;;  %s129_s29 = sshll.u32 %s187_s28, 4  ;;  %s130_s29 = int_to_ptr.vmem [resolvable:$true] %s129_s29 }
   0x7   :  { %148 = vmatprep.subr.bf16.mxu0 %v185_v8  ;;  %v139_v20 = vld [vmem:[%s252_s4] ss:$0 sm:$0xff]  ;;  %s161_s1 = scalar_lea.vmem %s130_s29, 32  ;;  %p166_p1 = scmp.lt.s32.totalorder %s130_s29, %s130_s29 }
   0x8   :  { %p162_p0 = scmp.ne.s32.totalorder %s130_s29, %s161_s1  ;;  %p167_p2 = scmp.lt.s32.totalorder %s161_s1, %s161_s1 }
   0xa   :  { %149 = vmatpush3.bf16.msra.mxu0 %v158_v9  ;;  %p168_p3 = por %p167_p2, %p166_p1 }
   0xc   :  { %p169_p4 = pnand %p168_p3, %p162_p0 }
  0x90   :  { %v28_v2 = vpop.xlane.xlu0 %27 }
  0x91   :  { %v30_v3 = vmul.f32 0.03125, %v28_v2 }
  0x93   :  { %v31_v4 = vsub.f32 %v22_v0, %v30_v3 }
  0x95   :  { %v32_v5 = vmul.f32 %v31_v4, %v31_v4 }
  0x97   :  { %v33_v6 = vsel %vm25_vm0, %v32_v5, 0.0 }
  0x98   :  { %34 = vadd.xlane.f32.xlu0 %v33_v6 }
 0x125   :  { %v35_v10 = vpop.xlane.xlu0 %34 }
 0x126   :  { %v36_v11 = vmul.f32 0.03125, %v35_v10 }
 0x128   :  { %v37_v12 = vadd.f32 1e-06, %v36_v11 }
 0x12a   :  { %159 = vrsqrt.f32 %v37_v12 }
 0x134   :  { %v160_v13 = vpop.eup %159 }
 0x135   :  { %v39_v15 = vmul.f32 %v160_v13, %v31_v4 }
 0x137   :  { %v46_v17 = vmul.f32 %v137_v14, %v39_v15 }
 0x139   :  { %v53_v18 = vadd.f32 %v138_v16, %v46_v17 }
 0x13b   :  { %v59_v19 = vpack.c.bf16 %v53_v18, %v53_v18 }
 0x13d   :  { %151 = vmatmul.mubr.msk.bf16.vlgmr.msra.gmra.mrb[0].mxu0 %vm78_vm2, %v59_v19 }
 0x210   :  { %v116_v21 = vpop.f32.mrb[0].mxu0 }
 0x211   :  { %v117_v22 = vadd.f32 %v139_v20, %v116_v21  ;;  %v152_v23 = vpop.f32.mrb[1].mxu0 }
 0x212   :  { %v119_v24 = vpop.f32.mrb[2].mxu0 }
 0x213   :  { %122 = vst [vmem:[#allocation2] sm:$0x3] %v117_v22  ;;  %v153_v25 = vpop.f32.mrb[3].mxu0 }
 0x214   :  { %172 = shalt.err (!%p169_p4)
}
 0x215   :  { %s173_s4 = scalar_lea.hbm %s253_s5, 32 }
 0x216   :  { %p174_p5 = scmp.ne.s32.totalorder %s253_s5, %s173_s4  ;;  %p177_p6 = scmp.lt.u32.totalorder %s173_s4, %s253_s5 }
 0x218   :  { %p179_p7 = pnand %p177_p6, %p174_p5 }
 0x21a   :  { %182 = shalt.err (!%p179_p7)
}
 0x21b   :  { %132 = dma.vmem_to_hbm [thread:$0]  %s130_s29, 32, %s253_s5, [#allocation3]  }
 0x21c   :  { %183 = dma.done.wait [#allocation3], 32  }
 0x21d   :  { %184 = vsyncadd [#allocation3], 4294967264 }
 0x21e   :  { %136 = vsyncpa [#allocation3], 1 }

// kernel: vit_forward.4
= control target key start
LH: loop header
LB: loop body
LE: loop exit
PB: predicated region body
PF: predicated region fallthrough
CT: control target
= control target key end

     0   :  { %s2076_s25 = smov 0   ;;  %s2078_s26 = smov 0   ;;  %s2341_s0 = inlined_call_operand.vmem [shape: f32[2,8,32], index: 0, kind: input, shape index: {}]   ;;  %s2342_s1 = inlined_call_operand.vmem [shape: f32[2,1,32], index: 1, kind: input, shape index: {}]   ;;  %s2343_s2 = inlined_call_operand.vmem [shape: f32[2,1,32], index: 2, kind: input, shape index: {}]   ;;  %s2344_s3 = inlined_call_operand.vmem [shape: bf16[2,32,96], index: 3, kind: input, shape index: {}]   ;;  %s2345_s4 = inlined_call_operand.vmem [shape: f32[2,1,96], index: 4, kind: input, shape index: {}]   ;;  %s2346_s5 = inlined_call_operand.vmem [shape: bf16[2,32,32], index: 5, kind: input, shape index: {}]   ;;  %s2347_s6 = inlined_call_operand.vmem [shape: f32[2,1,32], index: 6, kind: input, shape index: {}]   ;;  %s2348_s7 = inlined_call_operand.vmem [shape: f32[2,1,32], index: 7, kind: input, shape index: {}]   ;;  %s2349_s8 = inlined_call_operand.vmem [shape: f32[2,1,32], index: 8, kind: input, shape index: {}]   ;;  %s2350_s9 = inlined_call_operand.vmem [shape: bf16[2,32,64], index: 9, kind: input, shape index: {}]   ;;  %s2351_s10 = inlined_call_operand.vmem [shape: f32[2,1,64], index: 10, kind: input, shape index: {}]   ;;  %s2352_s11 = inlined_call_operand.vmem [shape: bf16[2,64,32], index: 11, kind: input, shape index: {}]   ;;  %s2353_s12 = inlined_call_operand.vmem [shape: f32[2,1,32], index: 12, kind: input, shape index: {}]   ;;  %s2354_s13 = inlined_call_operand.vmem [shape: f32[2,8,32], index: 13, kind: output, shape index: {}]  }
   0x1   :  { %2359 = sst [smem:[#allocation9_spill]] %s2341_s0  ;;  %s2080_s27 = smov 0  }
   0x2   :  { %2360 = sst [smem:[#allocation10_spill]] %s2343_s2  ;;  %s2082_s28 = smov 0  }
   0x3   :  { %2361 = sst [smem:[#allocation11_spill]] %s2344_s3  ;;  %s2084_s29 = smov 0  }
   0x4   :  { %2362 = sst [smem:[#allocation12_spill]] %s2346_s5 }
   0x5   :  { %2363 = sst [smem:[#allocation13_spill]] %s2354_s13 }
   0x6 LB: > { %2364 = sst [smem:[#allocation3_spill]] %s1970_s25  ;;  %s32_s30 = sadd.s32 1, %s1978_s27  ;;  %s1986_s29 = sphi %s2084_s29, %s23_s29   ;;  %s1982_s28 = sphi %s2082_s28, %s2387_s28   ;;  %s1978_s27 = sphi %s2080_s27, %s2386_s27   ;;  %s1974_s26 = sphi %s2078_s26, %s2385_s26   ;;  %s1970_s25 = sphi %s2076_s25, %s2384_s25  }
   0x7   : > { %2365 = sst [smem:[#allocation4_spill]] %s1978_s27  ;;  %s35_s14 = sadd.s32 1, %s1982_s28 }
   0x8   : > { %2366 = sst [smem:[#allocation5_spill]] %s1982_s28  ;;  %p33_p0 = scmp.ge.s32.totalorder %s32_s30, 2 }
   0x9   : > { %2367 = sst [smem:[#allocation6_spill]] %s1986_s29  ;;  %p1688_p1 = scmp.ge.s32.totalorder %s1986_s29, 1 }
   0xa   : > { %p502_p2 = scmp.lt.s32.totalorder %s1986_s29, 5  ;;  %s2389_s30 = smov (%p33_p0, %s32_s30), 0 }
   0xb   : > { %2368 = sst [smem:[#allocation7_spill]] %s2389_s30  ;;  %s2391_s14 = smov (!%p33_p0, %s35_s14), %s1982_s28 }
   0xc   : > { %p503_p3 = pnand %p1688_p1, %p502_p2  ;;  %p37_p4 = scmp.ge.s32.totalorder %s2391_s14, 2 }
   0xd   : > { %p588_p5 = scmp.lt.s32.totalorder (!%p503_p3), %s1974_s26, 1  ;;  %p592_p6 = scmp.lt.s32.totalorder (!%p503_p3), %s1970_s25, 1 }
   0xe   : > { %s2393_s14 = smov (%p37_p4, %s2391_s14), 0  ;;  %506 = sbr.rel (%p503_p3) target bundleno = 2638 (0xa4e), region = 72 }
   0xf   : > { %2369 = sst [smem:[#allocation8_spill]] %s2393_s14  ;;  %s2370_s0 = sld [smem:[#allocation9_spill]] (!%p503_p3) }
  0x10   : > { %s2372_s3 = sld [smem:[#allocation11_spill]] (!%p503_p3)  ;;  %s2373_s5 = sld [smem:[#allocation12_spill]] (!%p503_p3) }
  0x15   : > { %s2395_s26 = smov (!%p588_p5, %s1974_s26), 1 }
  0x16   : > { %s2110_s15 = scalar_select %p592_p6, %s1970_s25, 1 }
  0x17   : > { %s1689_s16 = sshll.u32 %s2395_s26, 3 }
  0x18   : > { %s591_s19 = scalar_lea.vmem %s2370_s0, %s1689_s16  ;;  %s1735_s30 = sshll.u32 %s2110_s15, 4 }
  0x19   : > { %s2127_s29 = scalar_lea.vmem %s2372_s3, %s1735_s30  ;;  %s2136_s0 = scalar_lea.vmem %s2373_s5, %s1735_s30 }
  0x1a   : > { %s2153_s26 = scalar_lea.vmem %s2350_s9, %s1735_s30  ;;  %s627_s13 = scalar_lea.vmem %s2351_s10, %s2110_s15 }
  0x1b   : > { %s1738_s5 = sshll.u32 %s2110_s15, 5  ;;  %s635_s23 = scalar_lea.vmem %s2353_s12, %s2110_s15 }
  0x1c   : > { %s2167_s22 = scalar_lea.vmem %s2352_s11, %s1738_s5  ;;  %s2374_s3 = sld [smem:[#allocation13_spill]] }
  0x1d   : > { %s2375_s30 = sld [smem:[#allocation3_spill]] }
  0x22   : > { %s2172_s2 = scalar_lea.vmem %s2374_s3, %s1689_s16 }
  0x23   : > { %p1699_p7 = scmp.ne.s32.totalorder %s2375_s30, 0 }
  0x24   : > { %v645_v0 = vld [vmem:[%s591_s19] sm:$0xff] (!%p1699_p7)  ;;  %vm646_vm0 = vcmask (!%p1699_p7), 261120  }
  0x25   : > { %644 = sbr.rel (%p1699_p7) target bundleno = 44 (0x2c), region = 76  ;;  %647 = vst.msk [vmem:[%s2172_s2] sm:$0xff] (!%p1699_p7), %vm646_vm0, %v645_v0 }
  0x2c PF: > { %v2177_v1 = vld [vmem:[%s2172_s2] sm:$0xff]  ;;  %vm651_vm1 = vcmask 261120   ;;  %v1988_v9 = vmov 0.0   ;;  %vm1989_vm2 = vmmov 0   ;;  %v1915_v10 = vld [vmem:[%s2127_s29 + $0x8] sm:$0xff]   ;;  %s2377_s25 = sld [smem:[#allocation10_spill]]  ;;  %s2379_s21 = scalar_lea.vmem %s2345_s4, %s2110_s15  ;;  %v747_v39 = vlaneseq }
  0x2d   : > { %v652_v2 = vsel %vm651_vm1, %v2177_v1, 0.0  ;;  %v1914_v8 = vld [vmem:[%s2127_s29] sm:$0xff]   ;;  %1772 = vmatprep.subr.bf16.mxu0 %v1988_v9  ;;  %1776 = vmatprep.mubr.msk.bf16.mxu0 %vm1989_vm2, %v1988_v9  ;;  %s2376_s29 = scalar_lea.vmem %s2342_s1, %s2110_s15  ;;  %s1990_s14 = smov 120   ;;  %vm755_vm3 = vcmask 64512   ;;  %v1997_v41 = vmov -1e+30  }
  0x2e   : > { %653 = vadd.xlane.f32.xlu0 %v652_v2  ;;  %1773 = vmatpush3.bf16.msra.mxu0 %v1914_v8  ;;  %v1700_v15 = vld [vmem:[%s2376_s29] ss:$0 sm:$0xff]  ;;  %s1991_s24 = smov 96   ;;  %s1992_s27 = smov 88   ;;  %v748_v40 = vand.u32 127, %v747_v39  ;;  %vm819_vm5 = vcmask 1043456  }
  0x2f   : > { %1780 = vmatprep.subr.bf16.mxu1 %v1988_v9  ;;  %1774 = vmatprep.subr.bf16.mxu0 %v1988_v9  ;;  %v1702_v21 = vld [vmem:[%s2379_s21] ss:$0 sm:$0xff]  ;;  %s1993_s28 = smov 80   ;;  %s1994_s30 = smov 112   ;;  %vm864_vm6 = vcmask 60416   ;;  %vm983_vm7 = vcmask 126016  }
  0x30   : > { %1782 = vmatprep.mubr.msk.bf16.mxu1 %vm1989_vm2, %v1988_v9  ;;  %s1995_s3 = smov 72   ;;  %s1996_s5 = smov 104   ;;  %vm749_vm4 = vcmp.lt.s32.totalorder %v748_v40, 5  ;;  %vm1102_vm8 = vcmask 191616   ;;  %vm1221_vm9 = vcmask 257216   ;;  %vm1454_vm11 = vcmask 523264  }
  0x31   : > { %v750_v42 = vsel %vm749_vm4, 0.0, %v1997_v41  ;;  %s1998_s29 = smov 64   ;;  %s1999_s16 = smov 56  }
  0x32   : > { %1775 = vmatpush3.bf16.msra.mxu0 %v1915_v10  ;;  %s2378_s17 = scalar_lea.vmem %s2377_s25, %s2110_s15  ;;  %s2000_s19 = smov 48  }
  0x33   : > { %1786 = vmatprep.subr.bf16.mxu0 %v1988_v9  ;;  %v1701_v17 = vld [vmem:[%s2378_s17] ss:$0 sm:$0xff]  ;;  %s2001_s25 = smov 40   ;;  %s2002_s17 = smov 8  }
  0x34   : > { %s2003_s18 = smov 16   ;;  %s2004_s20 = smov 24  }
  0xbb   : > { %v654_v3 = vpop.xlane.xlu0 %653 }
  0xbc   : > { %v656_v4 = vmul.f32 0.03125, %v654_v3 }
  0xbe   : > { %v657_v5 = vsub.f32 %v2177_v1, %v656_v4 }
  0xc0   : > { %v658_v6 = vmul.f32 %v657_v5, %v657_v5 }
  0xc2   : > { %v659_v7 = vsel %vm651_vm1, %v658_v6, 0.0 }
  0xc3   : > { %660 = vadd.xlane.f32.xlu0 %v659_v7 }
 0x150   : > { %v661_v11 = vpop.xlane.xlu0 %660 }
 0x151   : > { %v662_v12 = vmul.f32 0.03125, %v661_v11 }
 0x153   : > { %v663_v13 = vadd.f32 1e-06, %v662_v12 }
 0x155   : > { %1924 = vrsqrt.f32 %v663_v13 }
 0x15f   : > { %v1925_v14 = vpop.eup %1924 }
 0x160   : > { %v665_v16 = vmul.f32 %v1925_v14, %v657_v5 }
 0x162   : > { %v672_v18 = vmul.f32 %v1700_v15, %v665_v16 }
 0x164   : > { %v679_v19 = vadd.f32 %v1701_v17, %v672_v18 }
 0x166   : > { %v685_v20 = vpack.c.bf16 %v679_v19, %v679_v19 }
 0x168   : > { %1777 = vmatmul.mubr.msk.bf16.vlgmr.msra.gmra.mrb[0].mxu0 %vm651_vm1, %v685_v20 }
 0x169   : > { %1788 = vmatprep.mubr.msk.bf16.mxu0 %vm1989_vm2, %v1988_v9 }
 0x23b   : > { %v741_v22 = vpop.f32.mrb[0].mxu0 }
 0x23c   : > { %v742_v23 = vadd.f32 %v1702_v21, %v741_v22  ;;  %v1778_v24 = vpop.f32.mrb[1].mxu0 }
 0x23d   : > { %v744_v25 = vpop.f32.mrb[2].mxu0 }
 0x23e   : > { %v2211_v26 = vpack.c.bf16 %v742_v23, %v742_v23  ;;  %v1779_v27 = vpop.f32.mrb[3].mxu0 }
 0x240   : > { %866 = vrot.lane.b32.xlu0 %v2211_v26, %s1990_s14  ;;  %753 = vrot.lane.b32.xlu1 %v2211_v26, %s1991_s24  ;;  %s2380_s14 = scalar_lea.vmem %s2347_s6, %s2110_s15 }
 0x244   : > { %868 = vrot.lane.b32.xlu1 %v2211_v26, %s1992_s27 }
 0x248   : > { %987 = vrot.lane.b32.xlu1 %v2211_v26, %s1993_s28  ;;  %s2381_s28 = scalar_lea.vmem %s2348_s7, %s2110_s15 }
 0x24c   : > { %985 = vrot.lane.b32.xlu1 %v2211_v26, %s1994_s30 }
 0x250   : > { %1106 = vrot.lane.b32.xlu1 %v2211_v26, %s1995_s3 }
 0x254   : > { %1104 = vrot.lane.b32.xlu1 %v2211_v26, %s1996_s5 }
 0x2b2   : > { %v754_v28 = vpop.permute.xlu1 %753  ;;  %v867_v33 = vpop.permute.xlu0 %866 }
 0x2b3   : > { %v760_v29 = vsel %vm755_vm3, %v754_v28, 0 }
 0x2b4   : > { %1781 = vmatpush3.bf16.xpose.msra.mxu1 %v760_v29 }
 0x2b5   : > { %1792 = vmatprep.subr.bf16.mxu1 %v1988_v9 }
 0x2b6   : > { %v869_v30 = vpop.permute.xlu1 %868 }
 0x2b7   : > { %v874_v31 = vsel %vm755_vm3, %v869_v30, 0 }
 0x2ba   : > { %v988_v32 = vpop.permute.xlu1 %987 }
 0x2bb   : > { %1783 = vmatmul.mubr.msk.bf16.vlgmr.msra.gmra.mrb[0].mxu1 %vm755_vm3, %v2211_v26  ;;  %v993_v35 = vsel %vm755_vm3, %v988_v32, 0 }
 0x2bc   : > { %1793 = vmatpush3.bf16.xpose.msra.mxu1 %v874_v31  ;;  %1794 = vmatprep.mubr.msk.bf16.mxu1 %vm1989_vm2, %v1988_v9 }
 0x2bd   : > { %1804 = vmatprep.subr.bf16.mxu1 %v1988_v9 }
 0x2be   : > { %v986_v34 = vpop.permute.xlu1 %985 }
 0x2c2   : > { %v1107_v36 = vpop.permute.xlu1 %1106 }
 0x2c3   : > { %1795 = vmatmul.mubr.msk.bf16.vlgmr.msra.gmra.mrb[4].mxu1 %vm755_vm3, %v867_v33  ;;  %v1112_v37 = vsel %vm755_vm3, %v1107_v36, 0 }
 0x2c4   : > { %1805 = vmatpush3.bf16.xpose.msra.mxu1 %v993_v35  ;;  %1806 = vmatprep.mubr.msk.bf16.mxu1 %vm1989_vm2, %v1988_v9 }
 0x2c5   : > { %1816 = vmatprep.subr.bf16.mxu1 %v1988_v9 }
 0x2c6   : > { %v1105_v38 = vpop.permute.xlu1 %1104 }
 0x2cb   : > { %1807 = vmatmul.mubr.msk.bf16.vlgmr.msra.gmra.mrb[8].mxu1 %vm755_vm3, %v986_v34 }
 0x2cc   : > { %1817 = vmatpush3.bf16.xpose.msra.mxu1 %v1112_v37  ;;  %1818 = vmatprep.mubr.msk.bf16.mxu1 %vm1989_vm2, %v1988_v9 }
 0x2cd   : > { %1828 = vmatprep.subr.bf16.mxu1 %v1988_v9 }
 0x2d3   : > { %1819 = vmatmul.mubr.msk.bf16.vlgmr.msra.gmra.mrb[12].mxu1 %vm755_vm3, %v1105_v38 }
 0x2d4   : > { %1832 = vmatprep.mubr.msk.bf16.mxu1 %vm1989_vm2, %v1988_v9 }
 0x38e   : > { %v796_v43 = vpop.f32.mrb[0].mxu1 }
 0x38f   : > { %v797_v44 = vadd.f32 %v796_v43, %v750_v42  ;;  %v1784_v45 = vpop.f32.mrb[1].mxu1 }
 0x390   : > { %v799_v46 = vpop.f32.mrb[2].mxu1 }
 0x391   : > { %v1785_v47 = vpop.f32.mrb[3].mxu1  ;;  %v802_v48 = vsel %vm755_vm3, %v797_v44, -inf }
 0x392   : > { %803 = vmax.xlane.f32.xlu1 %v802_v48 }
 0x396   : > { %v910_v49 = vpop.f32.mrb[4].mxu1 }
 0x397   : > { %v911_v50 = vadd.f32 %v910_v49, %v750_v42  ;;  %v1796_v51 = vpop.f32.mrb[5].mxu1 }
 0x398   : > { %v913_v52 = vpop.f32.mrb[6].mxu1 }
 0x399   : > { %v1797_v53 = vpop.f32.mrb[7].mxu1  ;;  %v916_v54 = vsel %vm755_vm3, %v911_v50, -inf }
 0x39a   : > { %917 = vmax.xlane.f32.xlu0 %v916_v54 }
 0x39e   : > { %v1029_v55 = vpop.f32.mrb[8].mxu1 }
 0x39f   : > { %v1030_v56 = vadd.f32 %v1029_v55, %v750_v42  ;;  %v1808_v57 = vpop.f32.mrb[9].mxu1 }
 0x3a0   : > { %v1032_v58 = vpop.f32.mrb[10].mxu1 }
 0x3a1   : > { %v1809_v59 = vpop.f32.mrb[11].mxu1  ;;  %v1035_v60 = vsel %vm755_vm3, %v1030_v56, -inf }
 0x3a2   : > { %1036 = vmax.xlane.f32.xlu1 %v1035_v60  ;;  %v1916_v59 = vld [vmem:[%s2136_s0] sm:$0xff]  }
 0x3a3   : > { %1829 = vmatpush3.bf16.msra.mxu1 %v1916_v59 }
 0x3a4   : > { %1830 = vmatprep.subr.bf16.mxu1 %v1988_v9 }
 0x3a6   : > { %v1148_v61 = vpop.f32.mrb[12].mxu1 }
 0x3a7   : > { %v1149_v62 = vadd.f32 %v1148_v61, %v750_v42  ;;  %v1820_v63 = vpop.f32.mrb[13].mxu1  ;;  %v1917_v61 = vld [vmem:[%s2136_s0 + $0x8] sm:$0xff]  }
 0x3a8   : > { %v1151_v0 = vpop.f32.mrb[14].mxu1  ;;  %1831 = vmatpush3.bf16.msra.mxu1 %v1917_v61 }
 0x3a9   : > { %v1821_v2 = vpop.f32.mrb[15].mxu1  ;;  %v1154_v3 = vsel %vm755_vm3, %v1149_v62, -inf  ;;  %1844 = vmatprep.subr.bf16.mxu1 %v1988_v9 }
 0x3aa   : > { %1155 = vmax.xlane.f32.xlu0 %v1154_v3 }
 0x41f   : > { %v804_v4 = vpop.xlane.xlu1 %803 }
 0x420   : > { %v805_v5 = vsub.f32 %v797_v44, %v804_v4 }
 0x422   : > { %v806_v6 = vmul.f32 1.442695, %v805_v5 }
 0x424   : > { %1926 = vpow2.f32 %v806_v6 }
 0x427   : > { %v918_v7 = vpop.xlane.xlu0 %917 }
 0x428   : > { %v919_v8 = vsub.f32 %v911_v50, %v918_v7 }
 0x42a   : > { %v920_v10 = vmul.f32 1.442695, %v919_v8 }
 0x42c   : > { %1928 = vpow2.f32 %v920_v10 }
 0x42e   : > { %v1927_v11 = vpop.eup %1926 }
 0x42f   : > { %v808_v12 = vsel %vm755_vm3, %v1927_v11, 0.0  ;;  %v1037_v20 = vpop.xlane.xlu1 %1036 }
 0x430   : > { %809 = vadd.xlane.f32.xlu1 %v808_v12  ;;  %v1038_v21 = vsub.f32 %v1030_v56, %v1037_v20 }
 0x432   : > { %v1039_v22 = vmul.f32 1.442695, %v1038_v21 }
 0x436   : > { %v1929_v13 = vpop.eup %1928 }
 0x437   : > { %v1156_v14 = vpop.xlane.xlu0 %1155  ;;  %v922_v15 = vsel %vm755_vm3, %v1929_v13, 0.0 }
 0x438   : > { %v1157_v16 = vsub.f32 %v1149_v62, %v1156_v14  ;;  %923 = vadd.xlane.f32.xlu0 %v922_v15 }
 0x43a   : > { %v1158_v17 = vmul.f32 1.442695, %v1157_v16 }
 0x43c   : > { %1930 = vpow2.f32 %v1158_v17 }
 0x43d   : > { %1932 = vpow2.f32 %v1039_v22 }
 0x441   : > { %814 = vrot.lane.b32.xlu1 %v2211_v26, %s1998_s29 }
 0x446   : > { %v1931_v18 = vpop.eup %1930 }
 0x447   : > { %v1160_v19 = vsel %vm755_vm3, %v1931_v18, 0.0  ;;  %v1933_v23 = vpop.eup %1932 }
 0x448   : > { %1161 = vadd.xlane.f32.xlu0 %v1160_v19  ;;  %v1041_v24 = vsel %vm755_vm3, %v1933_v23, 0.0 }
 0x45e   : > { %928 = vrot.lane.b32.xlu0 %v2211_v26, %s1999_s16 }
 0x465   : > { %1042 = vadd.xlane.f32.xlu1 %v1041_v24 }
 0x476   : > { %1047 = vrot.lane.b32.xlu1 %v2211_v26, %s2000_s19 }
 0x47a   : > { %1166 = vrot.lane.b32.xlu1 %v2211_v26, %s2001_s25 }
 0x4bd   : > { %v810_v25 = vpop.xlane.xlu1 %809 }
 0x4be   : > { %1934 = vrcp.f32 %v810_v25 }
 0x4c1   : > { %v815_v27 = vpop.permute.xlu1 %814 }
 0x4c2   : > { %v821_v28 = vsel %vm819_vm5, %v815_v27, 0  ;;  %v1918_v27 = vld [vmem:[%s2153_s26] sm:$0xff]  }
 0x4c3   : > { %1787 = vmatpush3.bf16.msra.mxu0 %v821_v28 }
 0x4c4   : > { %1798 = vmatprep.subr.bf16.mxu0 %v1988_v9 }
 0x4c5   : > { %v924_v30 = vpop.xlane.xlu0 %923 }
 0x4c6   : > { %1936 = vrcp.f32 %v924_v30 }
 0x4c8   : > { %v1935_v29 = vpop.eup %1934 }
 0x4c9   : > { %v812_v31 = vmul.f32 %v1935_v29, %v1927_v11 }
 0x4cb   : > { %v813_v32 = vpack.c.bf16 %v812_v31, %v812_v31 }
 0x4cd   : > { %1789 = vmatmul.mubr.msk.bf16.vlgmr.msra.gmra.mrb[4].mxu0 %vm755_vm3, %v813_v32  ;;  %v1721_v32 = vld [vmem:[%s2381_s28] ss:$0 sm:$0xff] }
 0x4ce   : > { %1800 = vmatprep.mubr.msk.bf16.mxu0 %vm1989_vm2, %v1988_v9 }
 0x4d0   : > { %v1937_v26 = vpop.eup %1936 }
 0x4d1   : > { %v926_v34 = vmul.f32 %v1937_v26, %v1929_v13  ;;  %v1717_v13 = vld [vmem:[%s2380_s14] ss:$0 sm:$0xff] }
 0x4d3   : > { %v927_v37 = vpack.c.bf16 %v926_v34, %v926_v34 }
 0x4d5   : > { %v1162_v33 = vpop.xlane.xlu0 %1161 }
 0x4d9   : > { %v929_v35 = vpop.permute.xlu0 %928 }
 0x4da   : > { %v934_v36 = vsel %vm819_vm5, %v929_v35, 0 }
 0x4db   : > { %1799 = vmatpush3.bf16.msra.mxu0 %v934_v36 }
 0x4dc   : > { %1810 = vmatprep.subr.bf16.mxu0 %v1988_v9 }
 0x4de   : > { %1801 = vmatmul.mubr.msk.bf16.vlgmr.msra.gmra.mrb[8].mxu0 %vm755_vm3, %v927_v37  ;;  %v1920_v37 = vld [vmem:[%s2167_s22] sm:$0xff]  }
 0x4df   : > { %1812 = vmatprep.mubr.msk.bf16.mxu0 %vm1989_vm2, %v1988_v9 }
 0x4f2   : > { %v1043_v38 = vpop.xlane.xlu1 %1042 }
 0x4f3   : > { %1938 = vrcp.f32 %v1043_v38  ;;  %v1921_v38 = vld [vmem:[%s2167_s22 + $0x8] sm:$0xff]  }
 0x4f4   : > { %1940 = vrcp.f32 %v1162_v33 }
 0x4f6   : > { %v1048_v39 = vpop.permute.xlu1 %1047 }
 0x4f7   : > { %v1053_v40 = vsel %vm819_vm5, %v1048_v39, 0  ;;  %v1922_v39 = vld [vmem:[%s2167_s22 + $0x10] sm:$0xff]  }
 0x4f8   : > { %1811 = vmatpush3.bf16.msra.mxu0 %v1053_v40  ;;  %v1923_v40 = vld [vmem:[%s2167_s22 + $0x18] sm:$0xff]  }
 0x4f9   : > { %1822 = vmatprep.subr.bf16.mxu0 %v1988_v9 }
 0x4fa   : > { %v1167_v43 = vpop.permute.xlu1 %1166 }
 0x4fb   : > { %v1172_v46 = vsel %vm819_vm5, %v1167_v43, 0 }
 0x4fd   : > { %v1939_v41 = vpop.eup %1938 }
 0x4fe   : > { %v1045_v42 = vmul.f32 %v1939_v41, %v1933_v23  ;;  %v1941_v45 = vpop.eup %1940  ;;  %v1723_v41 = vld [vmem:[%s627_s13] ss:$0 sm:$0xff] }
 0x4ff   : > { %v1164_v47 = vmul.f32 %v1941_v45, %v1931_v18 }
 0x500   : > { %v1046_v44 = vpack.c.bf16 %v1045_v42, %v1045_v42 }
 0x501   : > { %v1165_v48 = vpack.c.bf16 %v1164_v47, %v1164_v47 }
 0x502   : > { %1813 = vmatmul.mubr.msk.bf16.vlgmr.msra.gmra.mrb[12].mxu0 %vm755_vm3, %v1046_v44 }
 0x503   : > { %1823 = vmatpush3.bf16.msra.mxu0 %v1172_v46  ;;  %1824 = vmatprep.mubr.msk.bf16.mxu0 %vm1989_vm2, %v1988_v9 }
 0x504   : > { %1836 = vmatprep.subr.bf16.mxu0 %v1988_v9 }
 0x50a   : > { %1825 = vmatmul.mubr.msk.bf16.vlgmr.msra.gmra.mrb[16].mxu0 %vm755_vm3, %v1165_v48 }
 0x50b   : > { %1840 = vmatprep.mubr.msk.bf16.mxu0 %vm1989_vm2, %v1988_v9  ;;  %1837 = vmatpush3.bf16.msra.mxu0 %v1918_v27 }
 0x50c   : > { %1838 = vmatprep.subr.bf16.mxu0 %v1988_v9 }
 0x5a0   : > { %v857_v49 = vpop.f32.mrb[4].mxu0 }
 0x5a1   : > { %v863_v50 = vpack.c.bf16 %v857_v49, %v857_v49  ;;  %v1790_v51 = vpop.f32.mrb[5].mxu0 }
 0x5a2   : > { %v860_v52 = vpop.f32.mrb[6].mxu0 }
 0x5a3   : > { %865 = vst.msk [vmem:[#allocation2] sm:$0xf] %vm864_vm6, %v863_v50  ;;  %v1791_v53 = vpop.f32.mrb[7].mxu0 }
 0x5b1   : > { %v970_v54 = vpop.f32.mrb[8].mxu0 }
 0x5b2   : > { %v1739_v55 = vpack.c.bf16 %v970_v54, %v970_v54  ;;  %v1802_v56 = vpop.f32.mrb[9].mxu0 }
 0x5b3   : > { %v973_v57 = vpop.f32.mrb[10].mxu0 }
 0x5b4   : > { %980 = vrot.lane.b32.xlu0 %v1739_v55, %s2002_s17  ;;  %v1803_v58 = vpop.f32.mrb[11].mxu0 }
 0x5d5   : > { %v1089_v60 = vpop.f32.mrb[12].mxu0 }
 0x5d6   : > { %v1740_v62 = vpack.c.bf16 %v1089_v60, %v1089_v60  ;;  %v1814_v63 = vpop.f32.mrb[13].mxu0 }
 0x5d7   : > { %v1092_v0 = vpop.f32.mrb[14].mxu0 }
 0x5d8   : > { %1099 = vrot.lane.b32.xlu1 %v1740_v62, %s2003_s18  ;;  %v1815_v2 = vpop.f32.mrb[15].mxu0 }
 0x5dd   : > { %v1208_v3 = vpop.f32.mrb[16].mxu0 }
 0x5de   : > { %v1741_v4 = vpack.c.bf16 %v1208_v3, %v1208_v3  ;;  %v1826_v5 = vpop.f32.mrb[17].mxu0  ;;  %v2005_v3 = vmov -1.0  }
 0x5df   : > { %v1211_v6 = vpop.f32.mrb[18].mxu0 }
 0x5e0   : > { %1218 = vrot.lane.b32.xlu0 %v1741_v4, %s2004_s20  ;;  %v1827_v7 = vpop.f32.mrb[19].mxu0 }
 0x626   : > { %v981_v8 = vpop.permute.xlu0 %980 }
 0x627   : > { %984 = vst.msk [vmem:[#allocation2] sm:$0xf] %vm983_vm7, %v981_v8 }
 0x64a   : > { %v1100_v10 = vpop.permute.xlu1 %1099 }
 0x64b   : > { %1103 = vst.msk [vmem:[#allocation2] sm:$0xf] %vm1102_vm8, %v1100_v10 }
 0x652   : > { %v1219_v11 = vpop.permute.xlu0 %1218 }
 0x653   : > { %1222 = vst.msk [vmem:[#allocation2] sm:$0xf] %vm1221_vm9, %v1219_v11  ;;  %v1727_v11 = vld [vmem:[%s635_s23] ss:$0 sm:$0xff] }
 0x65a   : > { %v1223_v12 = vld [vmem:[#allocation2] sm:$0xf] }
 0x65b   : > { %1833 = vmatmul.mubr.msk.bf16.vlgmr.msra.gmra.mrb[16].mxu1 %vm651_vm1, %v1223_v12 }
 0x65c   : > { %1852 = vmatprep.mubr.msk.bf16.mxu1 %vm1989_vm2, %v1988_v9  ;;  %1845 = vmatpush3.bf16.msra.mxu1 %v1920_v37 }
 0x65d   : > { %1846 = vmatprep.subr.bf16.mxu1 %v1988_v9 }
 0x660   : > { %1847 = vmatpush3.bf16.msra.mxu1 %v1921_v38 }
 0x661   : > { %1848 = vmatprep.subr.bf16.mxu1 %v1988_v9 }
 0x664   : > { %1849 = vmatpush3.bf16.msra.mxu1 %v1922_v39 }
 0x665   : > { %1850 = vmatprep.subr.bf16.mxu1 %v1988_v9 }
 0x668   : > { %1851 = vmatpush3.bf16.msra.mxu1 %v1923_v40 }
 0x72e   : > { %v1284_v14 = vpop.f32.mrb[16].mxu1 }
 0x72f   : > { %v1285_v15 = vadd.f32 %v1717_v13, %v1284_v14  ;;  %v1834_v16 = vpop.f32.mrb[17].mxu1 }
 0x730   : > { %v1287_v17 = vpop.f32.mrb[18].mxu1 }
 0x731   : > { %v2286_v18 = vadd.f32 %v1285_v15, %v2177_v1  ;;  %v1835_v19 = vpop.f32.mrb[19].mxu1  ;;  %v1919_v1 = vld [vmem:[%s2153_s26 + $0x8] sm:$0xff]   ;;  %s2382_s26 = scalar_lea.vmem %s2349_s8, %s2110_s15 }
 0x732   : > { %1839 = vmatpush3.bf16.msra.mxu0 %v1919_v1  ;;  %v1722_v33 = vld [vmem:[%s2382_s26] ss:$0 sm:$0xff] }
 0x733   : > { %v1293_v20 = vsel %vm651_vm1, %v2286_v18, 0.0 }
 0x734   : > { %1294 = vadd.xlane.f32.xlu1 %v1293_v20 }
 0x7c1   : > { %v1295_v21 = vpop.xlane.xlu1 %1294 }
 0x7c2   : > { %v1296_v22 = vmul.f32 0.03125, %v1295_v21 }
 0x7c4   : > { %v1297_v23 = vsub.f32 %v2286_v18, %v1296_v22 }
 0x7c6   : > { %v1298_v24 = vmul.f32 %v1297_v23, %v1297_v23 }
 0x7c8   : > { %v1299_v25 = vsel %vm651_vm1, %v1298_v24, 0.0 }
 0x7c9   : > { %1300 = vadd.xlane.f32.xlu0 %v1299_v25 }
 0x856   : > { %v1301_v28 = vpop.xlane.xlu0 %1300 }
 0x857   : > { %v1302_v29 = vmul.f32 0.03125, %v1301_v28 }
 0x859   : > { %v1303_v30 = vadd.f32 1e-06, %v1302_v29 }
 0x85b   : > { %1942 = vrsqrt.f32 %v1303_v30 }
 0x865   : > { %v1943_v31 = vpop.eup %1942 }
 0x866   : > { %v1305_v26 = vmul.f32 %v1943_v31, %v1297_v23 }
 0x868   : > { %v1312_v34 = vmul.f32 %v1721_v32, %v1305_v26 }
 0x86a   : > { %v1319_v35 = vadd.f32 %v1722_v33, %v1312_v34 }
 0x86c   : > { %v1325_v36 = vpack.c.bf16 %v1319_v35, %v1319_v35 }
 0x86e   : > { %1841 = vmatmul.mubr.msk.bf16.vlgmr.msra.gmra.mrb[20].mxu0 %vm651_vm1, %v1325_v36 }
 0x941   : > { %v1381_v42 = vpop.f32.mrb[20].mxu0 }
 0x942   : > { %v1382_v43 = vadd.f32 %v1723_v41, %v1381_v42  ;;  %v1842_v44 = vpop.f32.mrb[21].mxu0 }
 0x943   : > { %v1384_v45 = vpop.f32.mrb[22].mxu0 }
 0x944   : > { %v1388_v46 = vmul.f32 0.70710677, %v1382_v43  ;;  %v1843_v47 = vpop.f32.mrb[23].mxu0  ;;  %v1387_v6 = vmul.f32 0.5, %v1382_v43 }
 0x946   : > { %v1391_v48 = vand.u32 2147483647, %v1388_v46  ;;  %vm1389_vm10 = vcmp.ge.f32.partialorder %v1388_v46, 0.0 }
 0x947   : > { %v1390_v4 = vsel %vm1389_vm10, 1.0, %v2005_v3 }
 0x948   : > { %v1392_v49 = vmul.f32 0.3275911, %v1391_v48  ;;  %v1405_v51 = vsub.f32 0.0, %v1391_v48 }
 0x94a   : > { %v1393_v50 = vadd.f32 1.0, %v1392_v49  ;;  %v1406_v9 = vmul.f32 %v1405_v51, %v1391_v48 }
 0x94c   : > { %1944 = vrcp.f32 %v1393_v50  ;;  %v1407_v55 = vmul.f32 1.442695, %v1406_v9 }
 0x94e   : > { %1946 = vpow2.f32 %v1407_v55 }
 0x956   : > { %v1945_v52 = vpop.eup %1944 }
 0x957   : > { %v1396_v53 = vmul.f32 1.0614054, %v1945_v52 }
 0x958   : > { %v1947_v63 = vpop.eup %1946 }
 0x959   : > { %v1397_v54 = vadd.f32 -1.4531521, %v1396_v53 }
 0x95b   : > { %v1398_v56 = vmul.f32 %v1945_v52, %v1397_v54 }
 0x95d   : > { %v1399_v57 = vadd.f32 1.4214138, %v1398_v56 }
 0x95f   : > { %v1400_v58 = vmul.f32 %v1945_v52, %v1399_v57 }
 0x961   : > { %v1401_v59 = vadd.f32 -0.28449672, %v1400_v58 }
 0x963   : > { %v1402_v60 = vmul.f32 %v1945_v52, %v1401_v59 }
 0x965   : > { %v1403_v61 = vadd.f32 0.2548296, %v1402_v60 }
 0x967   : > { %v1404_v62 = vmul.f32 %v1945_v52, %v1403_v61 }
 0x969   : > { %v1409_v0 = vmul.f32 %v1947_v63, %v1404_v62 }
 0x96b   : > { %v1410_v2 = vsub.f32 1.0, %v1409_v0 }
 0x96d   : > { %v1411_v5 = vmul.f32 %v1410_v2, %v1390_v4 }
 0x96f   : > { %v1412_v7 = vadd.f32 1.0, %v1411_v5 }
 0x971   : > { %v1413_v8 = vmul.f32 %v1412_v7, %v1387_v6 }
 0x973   : > { %v1423_v10 = vpack.c.bf16 %v1413_v8, %v1413_v8 }
 0x975   : > { %1853 = vmatmul.mubr.msk.bf16.vlgmr.msra.gmra.mrb[20].mxu1 %vm1454_vm11, %v1423_v10 }
 0xa48   : > { %v1492_v12 = vpop.f32.mrb[20].mxu1 }
 0xa49   : > { %v1493_v13 = vadd.f32 %v1727_v11, %v1492_v12  ;;  %v1854_v14 = vpop.f32.mrb[21].mxu1 }
 0xa4a   : > { %v1495_v15 = vpop.f32.mrb[22].mxu1 }
 0xa4b   : > { %v1498_v16 = vadd.f32 %v1493_v13, %v2286_v18  ;;  %v1855_v17 = vpop.f32.mrb[23].mxu1 }
 0xa4d   : > { %1499 = vst.msk [vmem:[%s2172_s2] sm:$0xff] %vm651_vm1, %v1498_v16 }
 0xa4e PF: > { %s2383_s16 = sld [smem:[#allocation6_spill]]  ;;  %s2384_s25 = sld [smem:[#allocation4_spill]] }
 0xa4f   : > { %s2385_s26 = sld [smem:[#allocation5_spill]]  ;;  %s2386_s27 = sld [smem:[#allocation7_spill]] }
 0xa50   : > { %s2387_s28 = sld [smem:[#allocation8_spill]] }
 0xa54   : > { %s23_s29 = sadd.s32 1, %s2383_s16  }
 0xa55   : > { %p20_p8 = scmp.ge.s32.totalorder %s23_s29, 6  }
 0xa57   :  { %22 = sbr.rel (!%p20_p8) target bundleno = 6 (0x6), region = 142 }

</bundles_post_ra>
